<compile_context>
chip_gen: v5e
topology: v5e:2x2
jax: 0.10.0
libtpu: 0.0.40
codegen_flags: <defaults>
</compile_context>

<pallas_src>
import functools
import math

import jax
import jax.numpy as jnp
from jax.experimental import pallas as pl
from jax.experimental.pallas import tpu as pltpu

# ----------------------- synthetic "parsers()" config -----------------------
BATCH = 2
SEQ = 8
HIDDEN = 32
NUM_LAYERS = 2
NUM_HEADS = 4
HEAD_DIM = HIDDEN // NUM_HEADS
INTERMEDIATE = 64
VOCAB = 100
MAX_POS = 64
TYPE_VOCAB = 2
NUM_FILTERS = 8
FILTER_SIZES = (2, 3, 4)
CLASS_NUM = 3
LN_EPS = 1e-12
LANE_PAD = 128          # lane-dense FC output slab width
QKV_PAD = 128           # 3*HIDDEN = 96 lane-padded to a full vreg width
FFN_PAD = 128           # INTERMEDIATE = 64 lane-padded to a full vreg width


# ------------------------------ fused kernel ---------------------------------
def _ln(x, g, b):
    mean = jnp.mean(x, axis=-1, keepdims=True)
    c = x - mean
    var = jnp.mean(c * c, axis=-1, keepdims=True)
    return c * jax.lax.rsqrt(var + LN_EPS) * g + b


def _bert_textcnn_kernel(
    emb_ref, mask_ref, embg_ref, embb_ref,
    wqkv_ref, bqkv_ref, wo_ref, bo_ref, ln1g_ref, ln1b_ref,
    w1_ref, b1_ref, w2_ref, b2_ref, ln2g_ref, ln2b_ref,
    cw0_ref, cw1_ref, cw2_ref, cb0_ref, cb1_ref, cb2_ref,
    fcw_ref, fcb_ref,
    out_ref,
):
    bf16 = jnp.bfloat16
    scale = 1.0 / math.sqrt(HEAD_DIM)

    # ---- embedding LayerNorm ----
    x = _ln(emb_ref[0], embg_ref[...], embb_ref[...])          # [S, H] f32
    mask = mask_ref[0]                                          # [1, S] additive attn mask

    # ---- full transformer stack, unrolled in-kernel (weights VMEM-resident) ----
    for l in range(NUM_LAYERS):
        # fused, lane-padded QKV projection: one [S,H] x [H,128] MXU pass, unmasked lanes
        qkv = jnp.dot(x.astype(bf16), wqkv_ref[l],
                      preferred_element_type=jnp.float32) + bqkv_ref[l]      # [S, 128]

        # per-head attention; contexts concatenated -> single merged out-projection
        ctx_heads = []
        for h in range(NUM_HEADS):
            lo = h * HEAD_DIM
            q_h = qkv[:, lo:lo + HEAD_DIM].astype(bf16)
            k_h = qkv[:, HIDDEN + lo:HIDDEN + lo + HEAD_DIM].astype(bf16)
            v_h = qkv[:, 2 * HIDDEN + lo:2 * HIDDEN + lo + HEAD_DIM].astype(bf16)
            s = jax.lax.dot_general(q_h, k_h, (((1,), (1,)), ((), ())),
                                    preferred_element_type=jnp.float32)      # q @ k^T [S,S]
            s = s * scale + mask
            s = s - jnp.max(s, axis=-1, keepdims=True)
            p = jnp.exp(s)
            p = p * pl.reciprocal(jnp.sum(p, axis=-1, keepdims=True), approx=True)
            ctx_heads.append(jnp.dot(p.astype(bf16), v_h,
                                     preferred_element_type=jnp.float32))    # [S, d]
        ctx = jnp.concatenate(ctx_heads, axis=1)                             # [S, H]
        attn = jnp.dot(ctx.astype(bf16), wo_ref[l],
                       preferred_element_type=jnp.float32) + bo_ref[l]       # [S, H]

        # residual + LN1, FFN (bias + GELU fused, zero-padded intermediate), residual + LN2
        x1 = _ln(x + attn, ln1g_ref[l], ln1b_ref[l])
        h1 = jnp.dot(x1.astype(bf16), w1_ref[l],
                     preferred_element_type=jnp.float32) + b1_ref[l]         # [S, 128]
        # TODO(synk): HF BERT uses exact erf-GELU; tanh approximation kept (Mosaic-safe, tiny delta).
        h1 = jax.nn.gelu(h1, approximate=True)
        h2 = jnp.dot(h1.astype(bf16), w2_ref[l],
                     preferred_element_type=jnp.float32) + b2_ref[l]         # [S, H]
        x = _ln(x1 + h2, ln2g_ref[l], ln2b_ref[l])

    # ---- TextCNN head: 1 im2col matmul per filter size + 1 fused lane-dense FC matmul ----
    conv_ws = (cw0_ref, cw1_ref, cw2_ref)
    conv_bs = (cb0_ref, cb1_ref, cb2_ref)
    feats = []
    for idx, ksz in enumerate(FILTER_SIZES):
        L = SEQ - ksz + 1
        # im2col: taps concatenated along lanes -> one matmul instead of ksz tap matmuls
        patches = jnp.concatenate([x[i:i + L, :] for i in range(ksz)], axis=1)   # [L, k*H]
        acc = jnp.dot(patches.astype(bf16), conv_ws[idx][...],
                      preferred_element_type=jnp.float32) + conv_bs[idx][...]    # [L, F]
        acc = jnp.maximum(acc, 0.0)                                # bias + ReLU
        feats.append(jnp.max(acc, axis=0, keepdims=True))          # max_pool1d over time [1, F]
    feat = jnp.concatenate(feats, axis=1)                          # [1, 3F] (torch.cat order)
    # TODO(synk): nn.Dropout before fc is stochastic in train mode; inference identity used here.
    logits = jnp.dot(feat.astype(bf16), fcw_ref[...],
                     preferred_element_type=jnp.float32) + fcb_ref[...]          # [1, LANE_PAD]
    out_ref[0] = logits                                            # lane-dense slab


# --------------------------- parameter initialization ------------------------
def init_params(key):
    def nrm(k, shape, scale=0.02):
        return scale * jax.random.normal(k, shape, jnp.float32)

    keys = iter(jax.random.split(key, 256))
    p = {
        "word_emb": nrm(next(keys), (VOCAB, HIDDEN)),
        "pos_emb": nrm(next(keys), (MAX_POS, HIDDEN)),
        "type_emb": nrm(next(keys), (TYPE_VOCAB, HIDDEN)),
        "emb_ln_g": jnp.ones((HIDDEN,), jnp.float32),
        "emb_ln_b": jnp.zeros((HIDDEN,), jnp.float32),
        "layers": [],
    }
    for _ in range(NUM_LAYERS):
        p["layers"].append({
            "wq": nrm(next(keys), (HIDDEN, HIDDEN)), "bq": jnp.zeros((HIDDEN,)),
            "wk": nrm(next(keys), (HIDDEN, HIDDEN)), "bk": jnp.zeros((HIDDEN,)),
            "wv": nrm(next(keys), (HIDDEN, HIDDEN)), "bv": jnp.zeros((HIDDEN,)),
            "wo": nrm(next(keys), (HIDDEN, HIDDEN)), "bo": jnp.zeros((HIDDEN,)),
            "ln1_g": jnp.ones((HIDDEN,)), "ln1_b": jnp.zeros((HIDDEN,)),
            "w1": nrm(next(keys), (HIDDEN, INTERMEDIATE)), "b1": jnp.zeros((INTERMEDIATE,)),
            "w2": nrm(next(keys), (INTERMEDIATE, HIDDEN)), "b2": jnp.zeros((HIDDEN,)),
            "ln2_g": jnp.ones((HIDDEN,)), "ln2_b": jnp.zeros((HIDDEN,)),
        })
    # TextCNN head: Conv2d(1, F, (k, H)) weight [F,1,k,H] stored as [k,H,F]
    p["conv_w"] = [nrm(next(keys), (k, HIDDEN, NUM_FILTERS), 0.1) for k in FILTER_SIZES]
    p["conv_b"] = [jnp.zeros((NUM_FILTERS,), jnp.float32) for _ in FILTER_SIZES]
    p["fc_w"] = nrm(next(keys), (NUM_FILTERS * len(FILTER_SIZES), CLASS_NUM), 0.1)
    p["fc_b"] = jnp.zeros((CLASS_NUM,), jnp.float32)
    return p


def pack_params(params):
    """Stack per-layer weights along a layer axis, lane-pad matmul N dims, cast MXU operands to bf16."""
    bf = jnp.bfloat16
    layers = params["layers"]
    L = NUM_LAYERS

    wqkv = jnp.zeros((L, HIDDEN, QKV_PAD), jnp.float32)
    bqkv = jnp.zeros((L, 1, QKV_PAD), jnp.float32)
    w1 = jnp.zeros((L, HIDDEN, FFN_PAD), jnp.float32)
    b1 = jnp.zeros((L, 1, FFN_PAD), jnp.float32)
    w2 = jnp.zeros((L, FFN_PAD, HIDDEN), jnp.float32)
    for i, lp in enumerate(layers):
        wqkv = wqkv.at[i, :, :3 * HIDDEN].set(
            jnp.concatenate([lp["wq"], lp["wk"], lp["wv"]], axis=1))
        bqkv = bqkv.at[i, 0, :3 * HIDDEN].set(
            jnp.concatenate([lp["bq"], lp["bk"], lp["bv"]]))
        w1 = w1.at[i, :, :INTERMEDIATE].set(lp["w1"])
        b1 = b1.at[i, 0, :INTERMEDIATE].set(lp["b1"])
        w2 = w2.at[i, :INTERMEDIATE, :].set(lp["w2"])

    n_fc_in = NUM_FILTERS * len(FILTER_SIZES)
    fc_w = jnp.zeros((n_fc_in, LANE_PAD), jnp.float32).at[:, :CLASS_NUM].set(params["fc_w"])
    fc_b = jnp.zeros((1, LANE_PAD), jnp.float32).at[0, :CLASS_NUM].set(params["fc_b"])

    return {
        "word_emb": params["word_emb"],
        "pos_emb": params["pos_emb"],
        "type_emb": params["type_emb"],
        "emb_ln_g": params["emb_ln_g"].reshape(1, HIDDEN),
        "emb_ln_b": params["emb_ln_b"].reshape(1, HIDDEN),
        "wqkv": wqkv.astype(bf),                                  # [L, H, 128]
        "bqkv": bqkv,                                             # [L, 1, 128]
        "wo": jnp.stack([lp["wo"] for lp in layers]).astype(bf),  # [L, H, H]
        "bo": jnp.stack([lp["bo"][None, :] for lp in layers]),
        "ln1_g": jnp.stack([lp["ln1_g"][None, :] for lp in layers]),
        "ln1_b": jnp.stack([lp["ln1_b"][None, :] for lp in layers]),
        "w1": w1.astype(bf),                                      # [L, H, 128]
        "b1": b1,                                                 # [L, 1, 128]
        "w2": w2.astype(bf),                                      # [L, 128, H]
        "b2": jnp.stack([lp["b2"][None, :] for lp in layers]),
        "ln2_g": jnp.stack([lp["ln2_g"][None, :] for lp in layers]),
        "ln2_b": jnp.stack([lp["ln2_b"][None, :] for lp in layers]),
        "conv_w": [w.reshape(k * HIDDEN, NUM_FILTERS).astype(bf)  # im2col layout [k*H, F]
                   for k, w in zip(FILTER_SIZES, params["conv_w"])],
        "conv_b": [b.reshape(1, NUM_FILTERS) for b in params["conv_b"]],
        "fc_w": fc_w.astype(bf),                                  # [3F, 128] lane-padded
        "fc_b": fc_b,                                             # [1, 128] lane-padded
    }


# ------------------------------- model forward --------------------------------
def bert_text_model_forward(pk, input_ids, attention_mask, token_type_ids):
    B, S = input_ids.shape
    # ---- embeddings (gather = glue in plain JAX) ----
    pos_ids = jnp.arange(S, dtype=jnp.int32)
    emb = (pk["word_emb"][input_ids]
           + pk["pos_emb"][pos_ids][None, :, :]
           + pk["type_emb"][token_type_ids])                                 # [B, S, H]
    add_mask = ((1.0 - attention_mask.astype(jnp.float32)) * -1e9)[:, None, :]   # [B, 1, S]

    _b3 = lambda b: (b, 0, 0)      # per-batch block
    _c3 = lambda b: (0, 0, 0)      # grid-invariant 3-D (stacked layer weights, full block)
    _c2 = lambda b: (0, 0)         # grid-invariant 2-D

    in_specs = [
        pl.BlockSpec((1, SEQ, HIDDEN), _b3),                    # emb
        pl.BlockSpec((1, 1, SEQ), _b3),                         # additive attention mask
        pl.BlockSpec((1, HIDDEN), _c2),                         # emb LN gamma
        pl.BlockSpec((1, HIDDEN), _c2),                         # emb LN beta
        pl.BlockSpec((NUM_LAYERS, HIDDEN, QKV_PAD), _c3),       # wqkv (lane-padded)
        pl.BlockSpec((NUM_LAYERS, 1, QKV_PAD), _c3),            # bqkv
        pl.BlockSpec((NUM_LAYERS, HIDDEN, HIDDEN), _c3),        # wo
        pl.BlockSpec((NUM_LAYERS, 1, HIDDEN), _c3),             # bo
        pl.BlockSpec((NUM_LAYERS, 1, HIDDEN), _c3),             # ln1 gamma
        pl.BlockSpec((NUM_LAYERS, 1, HIDDEN), _c3),             # ln1 beta
        pl.BlockSpec((NUM_LAYERS, HIDDEN, FFN_PAD), _c3),       # w1 (lane-padded)
        pl.BlockSpec((NUM_LAYERS, 1, FFN_PAD), _c3),            # b1
        pl.BlockSpec((NUM_LAYERS, FFN_PAD, HIDDEN), _c3),       # w2 (zero-padded rows)
        pl.BlockSpec((NUM_LAYERS, 1, HIDDEN), _c3),             # b2
        pl.BlockSpec((NUM_LAYERS, 1, HIDDEN), _c3),             # ln2 gamma
        pl.BlockSpec((NUM_LAYERS, 1, HIDDEN), _c3),             # ln2 beta
    ]
    in_specs += [pl.BlockSpec((k * HIDDEN, NUM_FILTERS), _c2) for k in FILTER_SIZES]
    in_specs += [pl.BlockSpec((1, NUM_FILTERS), _c2) for _ in FILTER_SIZES]
    in_specs += [
        pl.BlockSpec((NUM_FILTERS * len(FILTER_SIZES), LANE_PAD), _c2),     # fc_w (lane-padded)
        pl.BlockSpec((1, LANE_PAD), _c2),                                   # fc_b (lane-padded)
    ]

    logits_pad = pl.pallas_call(
        _bert_textcnn_kernel,
        grid=(B,),                                              # layers unrolled inside kernel
        in_specs=in_specs,
        out_specs=pl.BlockSpec((1, 1, LANE_PAD), _b3),
        out_shape=jax.ShapeDtypeStruct((B, 1, LANE_PAD), jnp.float32),
        compiler_params=pltpu.CompilerParams(
            dimension_semantics=("parallel",)),                 # 2 TCs on v7x; serial elsewhere
    )(emb, add_mask, pk["emb_ln_g"], pk["emb_ln_b"],
      pk["wqkv"], pk["bqkv"], pk["wo"], pk["bo"], pk["ln1_g"], pk["ln1_b"],
      pk["w1"], pk["b1"], pk["w2"], pk["b2"], pk["ln2_g"], pk["ln2_b"],
      *pk["conv_w"], *pk["conv_b"], pk["fc_w"], pk["fc_b"])

    return logits_pad[:, 0, :CLASS_NUM]                         # slice lane-dense slab


# ------------------------------------ main ------------------------------------
if __name__ == "__main__":
    key = jax.random.PRNGKey(0)
    pkey, ikey = jax.random.split(key)
    packed = pack_params(init_params(pkey))

    input_ids = jax.random.randint(ikey, (BATCH, SEQ), 0, VOCAB, dtype=jnp.int32)
    attention_mask = jnp.ones((BATCH, SEQ), dtype=jnp.int32)
    token_type_ids = jnp.zeros((BATCH, SEQ), dtype=jnp.int32)

    fwd = jax.jit(functools.partial(bert_text_model_forward, packed))
    out = fwd(input_ids, attention_mask, token_type_ids)
    out = jax.block_until_ready(out)
    assert out.shape == (BATCH, CLASS_NUM), out.shape
    assert jnp.all(jnp.isfinite(out))
    print("KERNEL_OK")
</pallas_src>

<mosaic_0001>
module attributes {stable_mosaic.version = 11 : i64} {
  func.func @_bert_textcnn_kernel(%arg0: i32, %arg1: memref<1x8x32xf32, #tpu.memory_space<vmem>>, %arg2: memref<1x1x8xf32, #tpu.memory_space<vmem>>, %arg3: memref<1x32xf32, #tpu.memory_space<vmem>>, %arg4: memref<1x32xf32, #tpu.memory_space<vmem>>, %arg5: memref<2x32x128xbf16, #tpu.memory_space<vmem>>, %arg6: memref<2x1x128xf32, #tpu.memory_space<vmem>>, %arg7: memref<2x32x32xbf16, #tpu.memory_space<vmem>>, %arg8: memref<2x1x32xf32, #tpu.memory_space<vmem>>, %arg9: memref<2x1x32xf32, #tpu.memory_space<vmem>>, %arg10: memref<2x1x32xf32, #tpu.memory_space<vmem>>, %arg11: memref<2x32x128xbf16, #tpu.memory_space<vmem>>, %arg12: memref<2x1x128xf32, #tpu.memory_space<vmem>>, %arg13: memref<2x128x32xbf16, #tpu.memory_space<vmem>>, %arg14: memref<2x1x32xf32, #tpu.memory_space<vmem>>, %arg15: memref<2x1x32xf32, #tpu.memory_space<vmem>>, %arg16: memref<2x1x32xf32, #tpu.memory_space<vmem>>, %arg17: memref<64x8xbf16, #tpu.memory_space<vmem>>, %arg18: memref<96x8xbf16, #tpu.memory_space<vmem>>, %arg19: memref<128x8xbf16, #tpu.memory_space<vmem>>, %arg20: memref<1x8xf32, #tpu.memory_space<vmem>>, %arg21: memref<1x8xf32, #tpu.memory_space<vmem>>, %arg22: memref<1x8xf32, #tpu.memory_space<vmem>>, %arg23: memref<24x128xbf16, #tpu.memory_space<vmem>>, %arg24: memref<1x128xf32, #tpu.memory_space<vmem>>, %arg25: memref<1x1x128xf32, #tpu.memory_space<vmem>>) attributes {dimension_semantics = [#tpu.dimension_semantics<parallel>], iteration_bounds = array<i64: 2>, scalar_prefetch = 0 : i64, scratch_operands = 0 : i64, tpu.core_type = #tpu.core_type<tc>, window_params = [{transform_indices = @transform_0, window_bounds = array<i64: 1, 8, 32>}, {transform_indices = @transform_1, window_bounds = array<i64: 1, 1, 8>}, {pipeline_mode = #tpu.pipeline_mode<synchronous>, transform_indices = @transform_2, window_bounds = array<i64: 1, 32>}, {pipeline_mode = #tpu.pipeline_mode<synchronous>, transform_indices = @transform_3, window_bounds = array<i64: 1, 32>}, {pipeline_mode = #tpu.pipeline_mode<synchronous>, transform_indices = @transform_4, window_bounds = array<i64: 2, 32, 128>}, {pipeline_mode = #tpu.pipeline_mode<synchronous>, transform_indices = @transform_5, window_bounds = array<i64: 2, 1, 128>}, {pipeline_mode = #tpu.pipeline_mode<synchronous>, transform_indices = @transform_6, window_bounds = array<i64: 2, 32, 32>}, {pipeline_mode = #tpu.pipeline_mode<synchronous>, transform_indices = @transform_7, window_bounds = array<i64: 2, 1, 32>}, {pipeline_mode = #tpu.pipeline_mode<synchronous>, transform_indices = @transform_8, window_bounds = array<i64: 2, 1, 32>}, {pipeline_mode = #tpu.pipeline_mode<synchronous>, transform_indices = @transform_9, window_bounds = array<i64: 2, 1, 32>}, {pipeline_mode = #tpu.pipeline_mode<synchronous>, transform_indices = @transform_10, window_bounds = array<i64: 2, 32, 128>}, {pipeline_mode = #tpu.pipeline_mode<synchronous>, transform_indices = @transform_11, window_bounds = array<i64: 2, 1, 128>}, {pipeline_mode = #tpu.pipeline_mode<synchronous>, transform_indices = @transform_12, window_bounds = array<i64: 2, 128, 32>}, {pipeline_mode = #tpu.pipeline_mode<synchronous>, transform_indices = @transform_13, window_bounds = array<i64: 2, 1, 32>}, {pipeline_mode = #tpu.pipeline_mode<synchronous>, transform_indices = @transform_14, window_bounds = array<i64: 2, 1, 32>}, {pipeline_mode = #tpu.pipeline_mode<synchronous>, transform_indices = @transform_15, window_bounds = array<i64: 2, 1, 32>}, {pipeline_mode = #tpu.pipeline_mode<synchronous>, transform_indices = @transform_16, window_bounds = array<i64: 64, 8>}, {pipeline_mode = #tpu.pipeline_mode<synchronous>, transform_indices = @transform_17, window_bounds = array<i64: 96, 8>}, {pipeline_mode = #tpu.pipeline_mode<synchronous>, transform_indices = @transform_18, window_bounds = array<i64: 128, 8>}, {pipeline_mode = #tpu.pipeline_mode<synchronous>, transform_indices = @transform_19, window_bounds = array<i64: 1, 8>}, {pipeline_mode = #tpu.pipeline_mode<synchronous>, transform_indices = @transform_20, window_bounds = array<i64: 1, 8>}, {pipeline_mode = #tpu.pipeline_mode<synchronous>, transform_indices = @transform_21, window_bounds = array<i64: 1, 8>}, {pipeline_mode = #tpu.pipeline_mode<synchronous>, transform_indices = @transform_22, window_bounds = array<i64: 24, 128>}, {pipeline_mode = #tpu.pipeline_mode<synchronous>, transform_indices = @transform_23, window_bounds = array<i64: 1, 128>}, {transform_indices = @transform_24, window_bounds = array<i64: 1, 1, 128>}]} {
    %c0 = arith.constant 0 : index
    %c0_0 = arith.constant 0 : index
    %c0_1 = arith.constant 0 : index
    %0 = vector.load %arg1[%c0, %c0_0, %c0_1] : memref<1x8x32xf32, #tpu.memory_space<vmem>>, vector<1x8x32xf32>
    %1 = vector.shape_cast %0 : vector<1x8x32xf32> to vector<8x32xf32>
    %c0_2 = arith.constant 0 : index
    %c0_3 = arith.constant 0 : index
    %2 = vector.load %arg3[%c0_2, %c0_3] : memref<1x32xf32, #tpu.memory_space<vmem>>, vector<1x32xf32>
    %c0_4 = arith.constant 0 : index
    %c0_5 = arith.constant 0 : index
    %3 = vector.load %arg4[%c0_4, %c0_5] : memref<1x32xf32, #tpu.memory_space<vmem>>, vector<1x32xf32>
    %cst = arith.constant dense<0.000000e+00> : vector<8xf32>
    %4 = vector.multi_reduction <add>, %1, %cst [1] : vector<8x32xf32> to vector<8xf32>
    %5 = vector.shape_cast %4 : vector<8xf32> to vector<8x1xf32>
    %cst_6 = arith.constant 3.200000e+01 : f32
    %6 = vector.broadcast %cst_6 : f32 to vector<8x1xf32>
    %7 = arith.divf %5, %6 : vector<8x1xf32>
    %8 = vector.broadcast %7 : vector<8x1xf32> to vector<8x32xf32>
    %9 = arith.subf %1, %8 : vector<8x32xf32>
    %10 = arith.mulf %9, %9 : vector<8x32xf32>
    %cst_7 = arith.constant dense<0.000000e+00> : vector<8xf32>
    %11 = vector.multi_reduction <add>, %10, %cst_7 [1] : vector<8x32xf32> to vector<8xf32>
    %12 = vector.shape_cast %11 : vector<8xf32> to vector<8x1xf32>
    %cst_8 = arith.constant 3.200000e+01 : f32
    %13 = vector.broadcast %cst_8 : f32 to vector<8x1xf32>
    %14 = arith.divf %12, %13 : vector<8x1xf32>
    %cst_9 = arith.constant 9.99999996E-13 : f32
    %15 = vector.broadcast %cst_9 : f32 to vector<8x1xf32>
    %16 = arith.addf %14, %15 : vector<8x1xf32>
    %17 = math.rsqrt %16 : vector<8x1xf32>
    %18 = vector.broadcast %17 : vector<8x1xf32> to vector<8x32xf32>
    %19 = arith.mulf %9, %18 : vector<8x32xf32>
    %20 = vector.broadcast %2 : vector<1x32xf32> to vector<8x32xf32>
    %21 = arith.mulf %19, %20 : vector<8x32xf32>
    %22 = vector.broadcast %3 : vector<1x32xf32> to vector<8x32xf32>
    %23 = arith.addf %21, %22 : vector<8x32xf32>
    %c0_10 = arith.constant 0 : index
    %c0_11 = arith.constant 0 : index
    %c0_12 = arith.constant 0 : index
    %24 = vector.load %arg2[%c0_10, %c0_11, %c0_12] : memref<1x1x8xf32, #tpu.memory_space<vmem>>, vector<1x1x8xf32>
    %25 = vector.shape_cast %24 : vector<1x1x8xf32> to vector<1x8xf32>
    %26 = arith.truncf %23 : vector<8x32xf32> to vector<8x32xbf16>
    %c0_13 = arith.constant 0 : index
    %c0_14 = arith.constant 0 : index
    %c0_15 = arith.constant 0 : index
    %27 = vector.load %arg5[%c0_13, %c0_14, %c0_15] : memref<2x32x128xbf16, #tpu.memory_space<vmem>>, vector<1x32x128xbf16>
    %28 = vector.shape_cast %27 : vector<1x32x128xbf16> to vector<32x128xbf16>
    %cst_16 = arith.constant dense<0.000000e+00> : vector<8x128xf32>
    %29 = tpu.matmul %26, %28, %cst_16 {dimension_numbers = #tpu.dot_dimension_numbers<[1], [0], [0], [1], [0, 0, 1, 1], [], []>} : vector<8x32xbf16>, vector<32x128xbf16>, vector<8x128xf32> -> vector<8x128xf32>
    %c0_17 = arith.constant 0 : index
    %c0_18 = arith.constant 0 : index
    %c0_19 = arith.constant 0 : index
    %30 = vector.load %arg6[%c0_17, %c0_18, %c0_19] : memref<2x1x128xf32, #tpu.memory_space<vmem>>, vector<1x1x128xf32>
    %31 = vector.shape_cast %30 : vector<1x1x128xf32> to vector<1x128xf32>
    %32 = vector.broadcast %31 : vector<1x128xf32> to vector<8x128xf32>
    %33 = arith.addf %29, %32 : vector<8x128xf32>
    %34 = vector.extract_strided_slice %33 {offsets = [0, 0], sizes = [8, 8], strides = [1, 1]} : vector<8x128xf32> to vector<8x8xf32>
    %35 = arith.truncf %34 : vector<8x8xf32> to vector<8x8xbf16>
    %36 = vector.extract_strided_slice %33 {offsets = [0, 32], sizes = [8, 8], strides = [1, 1]} : vector<8x128xf32> to vector<8x8xf32>
    %37 = arith.truncf %36 : vector<8x8xf32> to vector<8x8xbf16>
    %38 = vector.extract_strided_slice %33 {offsets = [0, 64], sizes = [8, 8], strides = [1, 1]} : vector<8x128xf32> to vector<8x8xf32>
    %39 = arith.truncf %38 : vector<8x8xf32> to vector<8x8xbf16>
    %cst_20 = arith.constant dense<0.000000e+00> : vector<8x8xf32>
    %40 = tpu.matmul %35, %37, %cst_20 {dimension_numbers = #tpu.dot_dimension_numbers<[1], [1], [0], [0], [0, 0, 1, 0], [], []>} : vector<8x8xbf16>, vector<8x8xbf16>, vector<8x8xf32> -> vector<8x8xf32>
    %cst_21 = arith.constant 0.353553385 : f32
    %41 = vector.broadcast %cst_21 : f32 to vector<8x8xf32>
    %42 = arith.mulf %40, %41 : vector<8x8xf32>
    %43 = vector.broadcast %25 : vector<1x8xf32> to vector<8x8xf32>
    %44 = arith.addf %42, %43 : vector<8x8xf32>
    %cst_22 = arith.constant dense<0xFF800000> : vector<8xf32>
    %45 = vector.multi_reduction <maximumf>, %44, %cst_22 [1] : vector<8x8xf32> to vector<8xf32>
    %46 = vector.shape_cast %45 : vector<8xf32> to vector<8x1xf32>
    %47 = vector.broadcast %46 : vector<8x1xf32> to vector<8x8xf32>
    %48 = arith.subf %44, %47 : vector<8x8xf32>
    %49 = math.exp %48 : vector<8x8xf32>
    %cst_23 = arith.constant dense<0.000000e+00> : vector<8xf32>
    %50 = vector.multi_reduction <add>, %49, %cst_23 [1] : vector<8x8xf32> to vector<8xf32>
    %51 = vector.shape_cast %50 : vector<8xf32> to vector<8x1xf32>
    %52 = tpu.reciprocal %51 {approx = true} : vector<8x1xf32> -> vector<8x1xf32>
    %53 = vector.broadcast %52 : vector<8x1xf32> to vector<8x8xf32>
    %54 = arith.mulf %49, %53 : vector<8x8xf32>
    %55 = arith.truncf %54 : vector<8x8xf32> to vector<8x8xbf16>
    %cst_24 = arith.constant dense<0.000000e+00> : vector<8x8xf32>
    %56 = tpu.matmul %55, %39, %cst_24 {dimension_numbers = #tpu.dot_dimension_numbers<[1], [0], [0], [1], [0, 0, 1, 1], [], []>} : vector<8x8xbf16>, vector<8x8xbf16>, vector<8x8xf32> -> vector<8x8xf32>
    %57 = vector.extract_strided_slice %33 {offsets = [0, 8], sizes = [8, 8], strides = [1, 1]} : vector<8x128xf32> to vector<8x8xf32>
    %58 = arith.truncf %57 : vector<8x8xf32> to vector<8x8xbf16>
    %59 = vector.extract_strided_slice %33 {offsets = [0, 40], sizes = [8, 8], strides = [1, 1]} : vector<8x128xf32> to vector<8x8xf32>
    %60 = arith.truncf %59 : vector<8x8xf32> to vector<8x8xbf16>
    %61 = vector.extract_strided_slice %33 {offsets = [0, 72], sizes = [8, 8], strides = [1, 1]} : vector<8x128xf32> to vector<8x8xf32>
    %62 = arith.truncf %61 : vector<8x8xf32> to vector<8x8xbf16>
    %cst_25 = arith.constant dense<0.000000e+00> : vector<8x8xf32>
    %63 = tpu.matmul %58, %60, %cst_25 {dimension_numbers = #tpu.dot_dimension_numbers<[1], [1], [0], [0], [0, 0, 1, 0], [], []>} : vector<8x8xbf16>, vector<8x8xbf16>, vector<8x8xf32> -> vector<8x8xf32>
    %cst_26 = arith.constant 0.353553385 : f32
    %64 = vector.broadcast %cst_26 : f32 to vector<8x8xf32>
    %65 = arith.mulf %63, %64 : vector<8x8xf32>
    %66 = vector.broadcast %25 : vector<1x8xf32> to vector<8x8xf32>
    %67 = arith.addf %65, %66 : vector<8x8xf32>
    %cst_27 = arith.constant dense<0xFF800000> : vector<8xf32>
    %68 = vector.multi_reduction <maximumf>, %67, %cst_27 [1] : vector<8x8xf32> to vector<8xf32>
    %69 = vector.shape_cast %68 : vector<8xf32> to vector<8x1xf32>
    %70 = vector.broadcast %69 : vector<8x1xf32> to vector<8x8xf32>
    %71 = arith.subf %67, %70 : vector<8x8xf32>
    %72 = math.exp %71 : vector<8x8xf32>
    %cst_28 = arith.constant dense<0.000000e+00> : vector<8xf32>
    %73 = vector.multi_reduction <add>, %72, %cst_28 [1] : vector<8x8xf32> to vector<8xf32>
    %74 = vector.shape_cast %73 : vector<8xf32> to vector<8x1xf32>
    %75 = tpu.reciprocal %74 {approx = true} : vector<8x1xf32> -> vector<8x1xf32>
    %76 = vector.broadcast %75 : vector<8x1xf32> to vector<8x8xf32>
    %77 = arith.mulf %72, %76 : vector<8x8xf32>
    %78 = arith.truncf %77 : vector<8x8xf32> to vector<8x8xbf16>
    %cst_29 = arith.constant dense<0.000000e+00> : vector<8x8xf32>
    %79 = tpu.matmul %78, %62, %cst_29 {dimension_numbers = #tpu.dot_dimension_numbers<[1], [0], [0], [1], [0, 0, 1, 1], [], []>} : vector<8x8xbf16>, vector<8x8xbf16>, vector<8x8xf32> -> vector<8x8xf32>
    %80 = vector.extract_strided_slice %33 {offsets = [0, 16], sizes = [8, 8], strides = [1, 1]} : vector<8x128xf32> to vector<8x8xf32>
    %81 = arith.truncf %80 : vector<8x8xf32> to vector<8x8xbf16>
    %82 = vector.extract_strided_slice %33 {offsets = [0, 48], sizes = [8, 8], strides = [1, 1]} : vector<8x128xf32> to vector<8x8xf32>
    %83 = arith.truncf %82 : vector<8x8xf32> to vector<8x8xbf16>
    %84 = vector.extract_strided_slice %33 {offsets = [0, 80], sizes = [8, 8], strides = [1, 1]} : vector<8x128xf32> to vector<8x8xf32>
    %85 = arith.truncf %84 : vector<8x8xf32> to vector<8x8xbf16>
    %cst_30 = arith.constant dense<0.000000e+00> : vector<8x8xf32>
    %86 = tpu.matmul %81, %83, %cst_30 {dimension_numbers = #tpu.dot_dimension_numbers<[1], [1], [0], [0], [0, 0, 1, 0], [], []>} : vector<8x8xbf16>, vector<8x8xbf16>, vector<8x8xf32> -> vector<8x8xf32>
    %cst_31 = arith.constant 0.353553385 : f32
    %87 = vector.broadcast %cst_31 : f32 to vector<8x8xf32>
    %88 = arith.mulf %86, %87 : vector<8x8xf32>
    %89 = vector.broadcast %25 : vector<1x8xf32> to vector<8x8xf32>
    %90 = arith.addf %88, %89 : vector<8x8xf32>
    %cst_32 = arith.constant dense<0xFF800000> : vector<8xf32>
    %91 = vector.multi_reduction <maximumf>, %90, %cst_32 [1] : vector<8x8xf32> to vector<8xf32>
    %92 = vector.shape_cast %91 : vector<8xf32> to vector<8x1xf32>
    %93 = vector.broadcast %92 : vector<8x1xf32> to vector<8x8xf32>
    %94 = arith.subf %90, %93 : vector<8x8xf32>
    %95 = math.exp %94 : vector<8x8xf32>
    %cst_33 = arith.constant dense<0.000000e+00> : vector<8xf32>
    %96 = vector.multi_reduction <add>, %95, %cst_33 [1] : vector<8x8xf32> to vector<8xf32>
    %97 = vector.shape_cast %96 : vector<8xf32> to vector<8x1xf32>
    %98 = tpu.reciprocal %97 {approx = true} : vector<8x1xf32> -> vector<8x1xf32>
    %99 = vector.broadcast %98 : vector<8x1xf32> to vector<8x8xf32>
    %100 = arith.mulf %95, %99 : vector<8x8xf32>
    %101 = arith.truncf %100 : vector<8x8xf32> to vector<8x8xbf16>
    %cst_34 = arith.constant dense<0.000000e+00> : vector<8x8xf32>
    %102 = tpu.matmul %101, %85, %cst_34 {dimension_numbers = #tpu.dot_dimension_numbers<[1], [0], [0], [1], [0, 0, 1, 1], [], []>} : vector<8x8xbf16>, vector<8x8xbf16>, vector<8x8xf32> -> vector<8x8xf32>
    %103 = vector.extract_strided_slice %33 {offsets = [0, 24], sizes = [8, 8], strides = [1, 1]} : vector<8x128xf32> to vector<8x8xf32>
    %104 = arith.truncf %103 : vector<8x8xf32> to vector<8x8xbf16>
    %105 = vector.extract_strided_slice %33 {offsets = [0, 56], sizes = [8, 8], strides = [1, 1]} : vector<8x128xf32> to vector<8x8xf32>
    %106 = arith.truncf %105 : vector<8x8xf32> to vector<8x8xbf16>
    %107 = vector.extract_strided_slice %33 {offsets = [0, 88], sizes = [8, 8], strides = [1, 1]} : vector<8x128xf32> to vector<8x8xf32>
    %108 = arith.truncf %107 : vector<8x8xf32> to vector<8x8xbf16>
    %cst_35 = arith.constant dense<0.000000e+00> : vector<8x8xf32>
    %109 = tpu.matmul %104, %106, %cst_35 {dimension_numbers = #tpu.dot_dimension_numbers<[1], [1], [0], [0], [0, 0, 1, 0], [], []>} : vector<8x8xbf16>, vector<8x8xbf16>, vector<8x8xf32> -> vector<8x8xf32>
    %cst_36 = arith.constant 0.353553385 : f32
    %110 = vector.broadcast %cst_36 : f32 to vector<8x8xf32>
    %111 = arith.mulf %109, %110 : vector<8x8xf32>
    %112 = vector.broadcast %25 : vector<1x8xf32> to vector<8x8xf32>
    %113 = arith.addf %111, %112 : vector<8x8xf32>
    %cst_37 = arith.constant dense<0xFF800000> : vector<8xf32>
    %114 = vector.multi_reduction <maximumf>, %113, %cst_37 [1] : vector<8x8xf32> to vector<8xf32>
    %115 = vector.shape_cast %114 : vector<8xf32> to vector<8x1xf32>
    %116 = vector.broadcast %115 : vector<8x1xf32> to vector<8x8xf32>
    %117 = arith.subf %113, %116 : vector<8x8xf32>
    %118 = math.exp %117 : vector<8x8xf32>
    %cst_38 = arith.constant dense<0.000000e+00> : vector<8xf32>
    %119 = vector.multi_reduction <add>, %118, %cst_38 [1] : vector<8x8xf32> to vector<8xf32>
    %120 = vector.shape_cast %119 : vector<8xf32> to vector<8x1xf32>
    %121 = tpu.reciprocal %120 {approx = true} : vector<8x1xf32> -> vector<8x1xf32>
    %122 = vector.broadcast %121 : vector<8x1xf32> to vector<8x8xf32>
    %123 = arith.mulf %118, %122 : vector<8x8xf32>
    %124 = arith.truncf %123 : vector<8x8xf32> to vector<8x8xbf16>
    %cst_39 = arith.constant dense<0.000000e+00> : vector<8x8xf32>
    %125 = tpu.matmul %124, %108, %cst_39 {dimension_numbers = #tpu.dot_dimension_numbers<[1], [0], [0], [1], [0, 0, 1, 1], [], []>} : vector<8x8xbf16>, vector<8x8xbf16>, vector<8x8xf32> -> vector<8x8xf32>
    %126 = tpu.concatenate %56, %79, %102, %125 in 1 : vector<8x8xf32>, vector<8x8xf32>, vector<8x8xf32>, vector<8x8xf32> -> vector<8x32xf32>
    %127 = arith.truncf %126 : vector<8x32xf32> to vector<8x32xbf16>
    %c0_40 = arith.constant 0 : index
    %c0_41 = arith.constant 0 : index
    %c0_42 = arith.constant 0 : index
    %128 = vector.load %arg7[%c0_40, %c0_41, %c0_42] : memref<2x32x32xbf16, #tpu.memory_space<vmem>>, vector<1x32x32xbf16>
    %129 = vector.shape_cast %128 : vector<1x32x32xbf16> to vector<32x32xbf16>
    %cst_43 = arith.constant dense<0.000000e+00> : vector<8x32xf32>
    %130 = tpu.matmul %127, %129, %cst_43 {dimension_numbers = #tpu.dot_dimension_numbers<[1], [0], [0], [1], [0, 0, 1, 1], [], []>} : vector<8x32xbf16>, vector<32x32xbf16>, vector<8x32xf32> -> vector<8x32xf32>
    %c0_44 = arith.constant 0 : index
    %c0_45 = arith.constant 0 : index
    %c0_46 = arith.constant 0 : index
    %131 = vector.load %arg8[%c0_44, %c0_45, %c0_46] : memref<2x1x32xf32, #tpu.memory_space<vmem>>, vector<1x1x32xf32>
    %132 = vector.shape_cast %131 : vector<1x1x32xf32> to vector<1x32xf32>
    %133 = vector.broadcast %132 : vector<1x32xf32> to vector<8x32xf32>
    %134 = arith.addf %130, %133 : vector<8x32xf32>
    %135 = arith.addf %23, %134 : vector<8x32xf32>
    %c0_47 = arith.constant 0 : index
    %c0_48 = arith.constant 0 : index
    %c0_49 = arith.constant 0 : index
    %136 = vector.load %arg9[%c0_47, %c0_48, %c0_49] : memref<2x1x32xf32, #tpu.memory_space<vmem>>, vector<1x1x32xf32>
    %137 = vector.shape_cast %136 : vector<1x1x32xf32> to vector<1x32xf32>
    %c0_50 = arith.constant 0 : index
    %c0_51 = arith.constant 0 : index
    %c0_52 = arith.constant 0 : index
    %138 = vector.load %arg10[%c0_50, %c0_51, %c0_52] : memref<2x1x32xf32, #tpu.memory_space<vmem>>, vector<1x1x32xf32>
    %139 = vector.shape_cast %138 : vector<1x1x32xf32> to vector<1x32xf32>
    %cst_53 = arith.constant dense<0.000000e+00> : vector<8xf32>
    %140 = vector.multi_reduction <add>, %135, %cst_53 [1] : vector<8x32xf32> to vector<8xf32>
    %141 = vector.shape_cast %140 : vector<8xf32> to vector<8x1xf32>
    %cst_54 = arith.constant 3.200000e+01 : f32
    %142 = vector.broadcast %cst_54 : f32 to vector<8x1xf32>
    %143 = arith.divf %141, %142 : vector<8x1xf32>
    %144 = vector.broadcast %143 : vector<8x1xf32> to vector<8x32xf32>
    %145 = arith.subf %135, %144 : vector<8x32xf32>
    %146 = arith.mulf %145, %145 : vector<8x32xf32>
    %cst_55 = arith.constant dense<0.000000e+00> : vector<8xf32>
    %147 = vector.multi_reduction <add>, %146, %cst_55 [1] : vector<8x32xf32> to vector<8xf32>
    %148 = vector.shape_cast %147 : vector<8xf32> to vector<8x1xf32>
    %cst_56 = arith.constant 3.200000e+01 : f32
    %149 = vector.broadcast %cst_56 : f32 to vector<8x1xf32>
    %150 = arith.divf %148, %149 : vector<8x1xf32>
    %cst_57 = arith.constant 9.99999996E-13 : f32
    %151 = vector.broadcast %cst_57 : f32 to vector<8x1xf32>
    %152 = arith.addf %150, %151 : vector<8x1xf32>
    %153 = math.rsqrt %152 : vector<8x1xf32>
    %154 = vector.broadcast %153 : vector<8x1xf32> to vector<8x32xf32>
    %155 = arith.mulf %145, %154 : vector<8x32xf32>
    %156 = vector.broadcast %137 : vector<1x32xf32> to vector<8x32xf32>
    %157 = arith.mulf %155, %156 : vector<8x32xf32>
    %158 = vector.broadcast %139 : vector<1x32xf32> to vector<8x32xf32>
    %159 = arith.addf %157, %158 : vector<8x32xf32>
    %160 = arith.truncf %159 : vector<8x32xf32> to vector<8x32xbf16>
    %c0_58 = arith.constant 0 : index
    %c0_59 = arith.constant 0 : index
    %c0_60 = arith.constant 0 : index
    %161 = vector.load %arg11[%c0_58, %c0_59, %c0_60] : memref<2x32x128xbf16, #tpu.memory_space<vmem>>, vector<1x32x128xbf16>
    %162 = vector.shape_cast %161 : vector<1x32x128xbf16> to vector<32x128xbf16>
    %cst_61 = arith.constant dense<0.000000e+00> : vector<8x128xf32>
    %163 = tpu.matmul %160, %162, %cst_61 {dimension_numbers = #tpu.dot_dimension_numbers<[1], [0], [0], [1], [0, 0, 1, 1], [], []>} : vector<8x32xbf16>, vector<32x128xbf16>, vector<8x128xf32> -> vector<8x128xf32>
    %c0_62 = arith.constant 0 : index
    %c0_63 = arith.constant 0 : index
    %c0_64 = arith.constant 0 : index
    %164 = vector.load %arg12[%c0_62, %c0_63, %c0_64] : memref<2x1x128xf32, #tpu.memory_space<vmem>>, vector<1x1x128xf32>
    %165 = vector.shape_cast %164 : vector<1x1x128xf32> to vector<1x128xf32>
    %166 = vector.broadcast %165 : vector<1x128xf32> to vector<8x128xf32>
    %167 = arith.addf %163, %166 : vector<8x128xf32>
    %168 = arith.mulf %167, %167 : vector<8x128xf32>
    %169 = arith.mulf %167, %168 : vector<8x128xf32>
    %cst_65 = arith.constant 4.471500e-02 : f32
    %170 = vector.broadcast %cst_65 : f32 to vector<8x128xf32>
    %171 = arith.mulf %170, %169 : vector<8x128xf32>
    %172 = arith.addf %167, %171 : vector<8x128xf32>
    %cst_66 = arith.constant 0.797884583 : f32
    %173 = vector.broadcast %cst_66 : f32 to vector<8x128xf32>
    %174 = arith.mulf %173, %172 : vector<8x128xf32>
    %175 = math.tanh %174 : vector<8x128xf32>
    %cst_67 = arith.constant 1.000000e+00 : f32
    %176 = vector.broadcast %cst_67 : f32 to vector<8x128xf32>
    %177 = arith.addf %176, %175 : vector<8x128xf32>
    %cst_68 = arith.constant 5.000000e-01 : f32
    %178 = vector.broadcast %cst_68 : f32 to vector<8x128xf32>
    %179 = arith.mulf %178, %177 : vector<8x128xf32>
    %180 = arith.mulf %167, %179 : vector<8x128xf32>
    %181 = arith.truncf %180 : vector<8x128xf32> to vector<8x128xbf16>
    %c0_69 = arith.constant 0 : index
    %c0_70 = arith.constant 0 : index
    %c0_71 = arith.constant 0 : index
    %182 = vector.load %arg13[%c0_69, %c0_70, %c0_71] : memref<2x128x32xbf16, #tpu.memory_space<vmem>>, vector<1x128x32xbf16>
    %183 = vector.shape_cast %182 : vector<1x128x32xbf16> to vector<128x32xbf16>
    %cst_72 = arith.constant dense<0.000000e+00> : vector<8x32xf32>
    %184 = tpu.matmul %181, %183, %cst_72 {dimension_numbers = #tpu.dot_dimension_numbers<[1], [0], [0], [1], [0, 0, 1, 1], [], []>} : vector<8x128xbf16>, vector<128x32xbf16>, vector<8x32xf32> -> vector<8x32xf32>
    %c0_73 = arith.constant 0 : index
    %c0_74 = arith.constant 0 : index
    %c0_75 = arith.constant 0 : index
    %185 = vector.load %arg14[%c0_73, %c0_74, %c0_75] : memref<2x1x32xf32, #tpu.memory_space<vmem>>, vector<1x1x32xf32>
    %186 = vector.shape_cast %185 : vector<1x1x32xf32> to vector<1x32xf32>
    %187 = vector.broadcast %186 : vector<1x32xf32> to vector<8x32xf32>
    %188 = arith.addf %184, %187 : vector<8x32xf32>
    %189 = arith.addf %159, %188 : vector<8x32xf32>
    %c0_76 = arith.constant 0 : index
    %c0_77 = arith.constant 0 : index
    %c0_78 = arith.constant 0 : index
    %190 = vector.load %arg15[%c0_76, %c0_77, %c0_78] : memref<2x1x32xf32, #tpu.memory_space<vmem>>, vector<1x1x32xf32>
    %191 = vector.shape_cast %190 : vector<1x1x32xf32> to vector<1x32xf32>
    %c0_79 = arith.constant 0 : index
    %c0_80 = arith.constant 0 : index
    %c0_81 = arith.constant 0 : index
    %192 = vector.load %arg16[%c0_79, %c0_80, %c0_81] : memref<2x1x32xf32, #tpu.memory_space<vmem>>, vector<1x1x32xf32>
    %193 = vector.shape_cast %192 : vector<1x1x32xf32> to vector<1x32xf32>
    %cst_82 = arith.constant dense<0.000000e+00> : vector<8xf32>
    %194 = vector.multi_reduction <add>, %189, %cst_82 [1] : vector<8x32xf32> to vector<8xf32>
    %195 = vector.shape_cast %194 : vector<8xf32> to vector<8x1xf32>
    %cst_83 = arith.constant 3.200000e+01 : f32
    %196 = vector.broadcast %cst_83 : f32 to vector<8x1xf32>
    %197 = arith.divf %195, %196 : vector<8x1xf32>
    %198 = vector.broadcast %197 : vector<8x1xf32> to vector<8x32xf32>
    %199 = arith.subf %189, %198 : vector<8x32xf32>
    %200 = arith.mulf %199, %199 : vector<8x32xf32>
    %cst_84 = arith.constant dense<0.000000e+00> : vector<8xf32>
    %201 = vector.multi_reduction <add>, %200, %cst_84 [1] : vector<8x32xf32> to vector<8xf32>
    %202 = vector.shape_cast %201 : vector<8xf32> to vector<8x1xf32>
    %cst_85 = arith.constant 3.200000e+01 : f32
    %203 = vector.broadcast %cst_85 : f32 to vector<8x1xf32>
    %204 = arith.divf %202, %203 : vector<8x1xf32>
    %cst_86 = arith.constant 9.99999996E-13 : f32
    %205 = vector.broadcast %cst_86 : f32 to vector<8x1xf32>
    %206 = arith.addf %204, %205 : vector<8x1xf32>
    %207 = math.rsqrt %206 : vector<8x1xf32>
    %208 = vector.broadcast %207 : vector<8x1xf32> to vector<8x32xf32>
    %209 = arith.mulf %199, %208 : vector<8x32xf32>
    %210 = vector.broadcast %191 : vector<1x32xf32> to vector<8x32xf32>
    %211 = arith.mulf %209, %210 : vector<8x32xf32>
    %212 = vector.broadcast %193 : vector<1x32xf32> to vector<8x32xf32>
    %213 = arith.addf %211, %212 : vector<8x32xf32>
    %214 = arith.truncf %213 : vector<8x32xf32> to vector<8x32xbf16>
    %c1 = arith.constant 1 : index
    %c0_87 = arith.constant 0 : index
    %c0_88 = arith.constant 0 : index
    %215 = vector.load %arg5[%c1, %c0_87, %c0_88] : memref<2x32x128xbf16, #tpu.memory_space<vmem>>, vector<1x32x128xbf16>
    %216 = vector.shape_cast %215 : vector<1x32x128xbf16> to vector<32x128xbf16>
    %cst_89 = arith.constant dense<0.000000e+00> : vector<8x128xf32>
    %217 = tpu.matmul %214, %216, %cst_89 {dimension_numbers = #tpu.dot_dimension_numbers<[1], [0], [0], [1], [0, 0, 1, 1], [], []>} : vector<8x32xbf16>, vector<32x128xbf16>, vector<8x128xf32> -> vector<8x128xf32>
    %c1_90 = arith.constant 1 : index
    %c0_91 = arith.constant 0 : index
    %c0_92 = arith.constant 0 : index
    %218 = vector.load %arg6[%c1_90, %c0_91, %c0_92] : memref<2x1x128xf32, #tpu.memory_space<vmem>>, vector<1x1x128xf32>
    %219 = vector.shape_cast %218 : vector<1x1x128xf32> to vector<1x128xf32>
    %220 = vector.broadcast %219 : vector<1x128xf32> to vector<8x128xf32>
    %221 = arith.addf %217, %220 : vector<8x128xf32>
    %222 = vector.extract_strided_slice %221 {offsets = [0, 0], sizes = [8, 8], strides = [1, 1]} : vector<8x128xf32> to vector<8x8xf32>
    %223 = arith.truncf %222 : vector<8x8xf32> to vector<8x8xbf16>
    %224 = vector.extract_strided_slice %221 {offsets = [0, 32], sizes = [8, 8], strides = [1, 1]} : vector<8x128xf32> to vector<8x8xf32>
    %225 = arith.truncf %224 : vector<8x8xf32> to vector<8x8xbf16>
    %226 = vector.extract_strided_slice %221 {offsets = [0, 64], sizes = [8, 8], strides = [1, 1]} : vector<8x128xf32> to vector<8x8xf32>
    %227 = arith.truncf %226 : vector<8x8xf32> to vector<8x8xbf16>
    %cst_93 = arith.constant dense<0.000000e+00> : vector<8x8xf32>
    %228 = tpu.matmul %223, %225, %cst_93 {dimension_numbers = #tpu.dot_dimension_numbers<[1], [1], [0], [0], [0, 0, 1, 0], [], []>} : vector<8x8xbf16>, vector<8x8xbf16>, vector<8x8xf32> -> vector<8x8xf32>
    %cst_94 = arith.constant 0.353553385 : f32
    %229 = vector.broadcast %cst_94 : f32 to vector<8x8xf32>
    %230 = arith.mulf %228, %229 : vector<8x8xf32>
    %231 = vector.broadcast %25 : vector<1x8xf32> to vector<8x8xf32>
    %232 = arith.addf %230, %231 : vector<8x8xf32>
    %cst_95 = arith.constant dense<0xFF800000> : vector<8xf32>
    %233 = vector.multi_reduction <maximumf>, %232, %cst_95 [1] : vector<8x8xf32> to vector<8xf32>
    %234 = vector.shape_cast %233 : vector<8xf32> to vector<8x1xf32>
    %235 = vector.broadcast %234 : vector<8x1xf32> to vector<8x8xf32>
    %236 = arith.subf %232, %235 : vector<8x8xf32>
    %237 = math.exp %236 : vector<8x8xf32>
    %cst_96 = arith.constant dense<0.000000e+00> : vector<8xf32>
    %238 = vector.multi_reduction <add>, %237, %cst_96 [1] : vector<8x8xf32> to vector<8xf32>
    %239 = vector.shape_cast %238 : vector<8xf32> to vector<8x1xf32>
    %240 = tpu.reciprocal %239 {approx = true} : vector<8x1xf32> -> vector<8x1xf32>
    %241 = vector.broadcast %240 : vector<8x1xf32> to vector<8x8xf32>
    %242 = arith.mulf %237, %241 : vector<8x8xf32>
    %243 = arith.truncf %242 : vector<8x8xf32> to vector<8x8xbf16>
    %cst_97 = arith.constant dense<0.000000e+00> : vector<8x8xf32>
    %244 = tpu.matmul %243, %227, %cst_97 {dimension_numbers = #tpu.dot_dimension_numbers<[1], [0], [0], [1], [0, 0, 1, 1], [], []>} : vector<8x8xbf16>, vector<8x8xbf16>, vector<8x8xf32> -> vector<8x8xf32>
    %245 = vector.extract_strided_slice %221 {offsets = [0, 8], sizes = [8, 8], strides = [1, 1]} : vector<8x128xf32> to vector<8x8xf32>
    %246 = arith.truncf %245 : vector<8x8xf32> to vector<8x8xbf16>
    %247 = vector.extract_strided_slice %221 {offsets = [0, 40], sizes = [8, 8], strides = [1, 1]} : vector<8x128xf32> to vector<8x8xf32>
    %248 = arith.truncf %247 : vector<8x8xf32> to vector<8x8xbf16>
    %249 = vector.extract_strided_slice %221 {offsets = [0, 72], sizes = [8, 8], strides = [1, 1]} : vector<8x128xf32> to vector<8x8xf32>
    %250 = arith.truncf %249 : vector<8x8xf32> to vector<8x8xbf16>
    %cst_98 = arith.constant dense<0.000000e+00> : vector<8x8xf32>
    %251 = tpu.matmul %246, %248, %cst_98 {dimension_numbers = #tpu.dot_dimension_numbers<[1], [1], [0], [0], [0, 0, 1, 0], [], []>} : vector<8x8xbf16>, vector<8x8xbf16>, vector<8x8xf32> -> vector<8x8xf32>
    %cst_99 = arith.constant 0.353553385 : f32
    %252 = vector.broadcast %cst_99 : f32 to vector<8x8xf32>
    %253 = arith.mulf %251, %252 : vector<8x8xf32>
    %254 = vector.broadcast %25 : vector<1x8xf32> to vector<8x8xf32>
    %255 = arith.addf %253, %254 : vector<8x8xf32>
    %cst_100 = arith.constant dense<0xFF800000> : vector<8xf32>
    %256 = vector.multi_reduction <maximumf>, %255, %cst_100 [1] : vector<8x8xf32> to vector<8xf32>
    %257 = vector.shape_cast %256 : vector<8xf32> to vector<8x1xf32>
    %258 = vector.broadcast %257 : vector<8x1xf32> to vector<8x8xf32>
    %259 = arith.subf %255, %258 : vector<8x8xf32>
    %260 = math.exp %259 : vector<8x8xf32>
    %cst_101 = arith.constant dense<0.000000e+00> : vector<8xf32>
    %261 = vector.multi_reduction <add>, %260, %cst_101 [1] : vector<8x8xf32> to vector<8xf32>
    %262 = vector.shape_cast %261 : vector<8xf32> to vector<8x1xf32>
    %263 = tpu.reciprocal %262 {approx = true} : vector<8x1xf32> -> vector<8x1xf32>
    %264 = vector.broadcast %263 : vector<8x1xf32> to vector<8x8xf32>
    %265 = arith.mulf %260, %264 : vector<8x8xf32>
    %266 = arith.truncf %265 : vector<8x8xf32> to vector<8x8xbf16>
    %cst_102 = arith.constant dense<0.000000e+00> : vector<8x8xf32>
    %267 = tpu.matmul %266, %250, %cst_102 {dimension_numbers = #tpu.dot_dimension_numbers<[1], [0], [0], [1], [0, 0, 1, 1], [], []>} : vector<8x8xbf16>, vector<8x8xbf16>, vector<8x8xf32> -> vector<8x8xf32>
    %268 = vector.extract_strided_slice %221 {offsets = [0, 16], sizes = [8, 8], strides = [1, 1]} : vector<8x128xf32> to vector<8x8xf32>
    %269 = arith.truncf %268 : vector<8x8xf32> to vector<8x8xbf16>
    %270 = vector.extract_strided_slice %221 {offsets = [0, 48], sizes = [8, 8], strides = [1, 1]} : vector<8x128xf32> to vector<8x8xf32>
    %271 = arith.truncf %270 : vector<8x8xf32> to vector<8x8xbf16>
    %272 = vector.extract_strided_slice %221 {offsets = [0, 80], sizes = [8, 8], strides = [1, 1]} : vector<8x128xf32> to vector<8x8xf32>
    %273 = arith.truncf %272 : vector<8x8xf32> to vector<8x8xbf16>
    %cst_103 = arith.constant dense<0.000000e+00> : vector<8x8xf32>
    %274 = tpu.matmul %269, %271, %cst_103 {dimension_numbers = #tpu.dot_dimension_numbers<[1], [1], [0], [0], [0, 0, 1, 0], [], []>} : vector<8x8xbf16>, vector<8x8xbf16>, vector<8x8xf32> -> vector<8x8xf32>
    %cst_104 = arith.constant 0.353553385 : f32
    %275 = vector.broadcast %cst_104 : f32 to vector<8x8xf32>
    %276 = arith.mulf %274, %275 : vector<8x8xf32>
    %277 = vector.broadcast %25 : vector<1x8xf32> to vector<8x8xf32>
    %278 = arith.addf %276, %277 : vector<8x8xf32>
    %cst_105 = arith.constant dense<0xFF800000> : vector<8xf32>
    %279 = vector.multi_reduction <maximumf>, %278, %cst_105 [1] : vector<8x8xf32> to vector<8xf32>
    %280 = vector.shape_cast %279 : vector<8xf32> to vector<8x1xf32>
    %281 = vector.broadcast %280 : vector<8x1xf32> to vector<8x8xf32>
    %282 = arith.subf %278, %281 : vector<8x8xf32>
    %283 = math.exp %282 : vector<8x8xf32>
    %cst_106 = arith.constant dense<0.000000e+00> : vector<8xf32>
    %284 = vector.multi_reduction <add>, %283, %cst_106 [1] : vector<8x8xf32> to vector<8xf32>
    %285 = vector.shape_cast %284 : vector<8xf32> to vector<8x1xf32>
    %286 = tpu.reciprocal %285 {approx = true} : vector<8x1xf32> -> vector<8x1xf32>
    %287 = vector.broadcast %286 : vector<8x1xf32> to vector<8x8xf32>
    %288 = arith.mulf %283, %287 : vector<8x8xf32>
    %289 = arith.truncf %288 : vector<8x8xf32> to vector<8x8xbf16>
    %cst_107 = arith.constant dense<0.000000e+00> : vector<8x8xf32>
    %290 = tpu.matmul %289, %273, %cst_107 {dimension_numbers = #tpu.dot_dimension_numbers<[1], [0], [0], [1], [0, 0, 1, 1], [], []>} : vector<8x8xbf16>, vector<8x8xbf16>, vector<8x8xf32> -> vector<8x8xf32>
    %291 = vector.extract_strided_slice %221 {offsets = [0, 24], sizes = [8, 8], strides = [1, 1]} : vector<8x128xf32> to vector<8x8xf32>
    %292 = arith.truncf %291 : vector<8x8xf32> to vector<8x8xbf16>
    %293 = vector.extract_strided_slice %221 {offsets = [0, 56], sizes = [8, 8], strides = [1, 1]} : vector<8x128xf32> to vector<8x8xf32>
    %294 = arith.truncf %293 : vector<8x8xf32> to vector<8x8xbf16>
    %295 = vector.extract_strided_slice %221 {offsets = [0, 88], sizes = [8, 8], strides = [1, 1]} : vector<8x128xf32> to vector<8x8xf32>
    %296 = arith.truncf %295 : vector<8x8xf32> to vector<8x8xbf16>
    %cst_108 = arith.constant dense<0.000000e+00> : vector<8x8xf32>
    %297 = tpu.matmul %292, %294, %cst_108 {dimension_numbers = #tpu.dot_dimension_numbers<[1], [1], [0], [0], [0, 0, 1, 0], [], []>} : vector<8x8xbf16>, vector<8x8xbf16>, vector<8x8xf32> -> vector<8x8xf32>
    %cst_109 = arith.constant 0.353553385 : f32
    %298 = vector.broadcast %cst_109 : f32 to vector<8x8xf32>
    %299 = arith.mulf %297, %298 : vector<8x8xf32>
    %300 = vector.broadcast %25 : vector<1x8xf32> to vector<8x8xf32>
    %301 = arith.addf %299, %300 : vector<8x8xf32>
    %cst_110 = arith.constant dense<0xFF800000> : vector<8xf32>
    %302 = vector.multi_reduction <maximumf>, %301, %cst_110 [1] : vector<8x8xf32> to vector<8xf32>
    %303 = vector.shape_cast %302 : vector<8xf32> to vector<8x1xf32>
    %304 = vector.broadcast %303 : vector<8x1xf32> to vector<8x8xf32>
    %305 = arith.subf %301, %304 : vector<8x8xf32>
    %306 = math.exp %305 : vector<8x8xf32>
    %cst_111 = arith.constant dense<0.000000e+00> : vector<8xf32>
    %307 = vector.multi_reduction <add>, %306, %cst_111 [1] : vector<8x8xf32> to vector<8xf32>
    %308 = vector.shape_cast %307 : vector<8xf32> to vector<8x1xf32>
    %309 = tpu.reciprocal %308 {approx = true} : vector<8x1xf32> -> vector<8x1xf32>
    %310 = vector.broadcast %309 : vector<8x1xf32> to vector<8x8xf32>
    %311 = arith.mulf %306, %310 : vector<8x8xf32>
    %312 = arith.truncf %311 : vector<8x8xf32> to vector<8x8xbf16>
    %cst_112 = arith.constant dense<0.000000e+00> : vector<8x8xf32>
    %313 = tpu.matmul %312, %296, %cst_112 {dimension_numbers = #tpu.dot_dimension_numbers<[1], [0], [0], [1], [0, 0, 1, 1], [], []>} : vector<8x8xbf16>, vector<8x8xbf16>, vector<8x8xf32> -> vector<8x8xf32>
    %314 = tpu.concatenate %244, %267, %290, %313 in 1 : vector<8x8xf32>, vector<8x8xf32>, vector<8x8xf32>, vector<8x8xf32> -> vector<8x32xf32>
    %315 = arith.truncf %314 : vector<8x32xf32> to vector<8x32xbf16>
    %c1_113 = arith.constant 1 : index
    %c0_114 = arith.constant 0 : index
    %c0_115 = arith.constant 0 : index
    %316 = vector.load %arg7[%c1_113, %c0_114, %c0_115] : memref<2x32x32xbf16, #tpu.memory_space<vmem>>, vector<1x32x32xbf16>
    %317 = vector.shape_cast %316 : vector<1x32x32xbf16> to vector<32x32xbf16>
    %cst_116 = arith.constant dense<0.000000e+00> : vector<8x32xf32>
    %318 = tpu.matmul %315, %317, %cst_116 {dimension_numbers = #tpu.dot_dimension_numbers<[1], [0], [0], [1], [0, 0, 1, 1], [], []>} : vector<8x32xbf16>, vector<32x32xbf16>, vector<8x32xf32> -> vector<8x32xf32>
    %c1_117 = arith.constant 1 : index
    %c0_118 = arith.constant 0 : index
    %c0_119 = arith.constant 0 : index
    %319 = vector.load %arg8[%c1_117, %c0_118, %c0_119] : memref<2x1x32xf32, #tpu.memory_space<vmem>>, vector<1x1x32xf32>
    %320 = vector.shape_cast %319 : vector<1x1x32xf32> to vector<1x32xf32>
    %321 = vector.broadcast %320 : vector<1x32xf32> to vector<8x32xf32>
    %322 = arith.addf %318, %321 : vector<8x32xf32>
    %323 = arith.addf %213, %322 : vector<8x32xf32>
    %c1_120 = arith.constant 1 : index
    %c0_121 = arith.constant 0 : index
    %c0_122 = arith.constant 0 : index
    %324 = vector.load %arg9[%c1_120, %c0_121, %c0_122] : memref<2x1x32xf32, #tpu.memory_space<vmem>>, vector<1x1x32xf32>
    %325 = vector.shape_cast %324 : vector<1x1x32xf32> to vector<1x32xf32>
    %c1_123 = arith.constant 1 : index
    %c0_124 = arith.constant 0 : index
    %c0_125 = arith.constant 0 : index
    %326 = vector.load %arg10[%c1_123, %c0_124, %c0_125] : memref<2x1x32xf32, #tpu.memory_space<vmem>>, vector<1x1x32xf32>
    %327 = vector.shape_cast %326 : vector<1x1x32xf32> to vector<1x32xf32>
    %cst_126 = arith.constant dense<0.000000e+00> : vector<8xf32>
    %328 = vector.multi_reduction <add>, %323, %cst_126 [1] : vector<8x32xf32> to vector<8xf32>
    %329 = vector.shape_cast %328 : vector<8xf32> to vector<8x1xf32>
    %cst_127 = arith.constant 3.200000e+01 : f32
    %330 = vector.broadcast %cst_127 : f32 to vector<8x1xf32>
    %331 = arith.divf %329, %330 : vector<8x1xf32>
    %332 = vector.broadcast %331 : vector<8x1xf32> to vector<8x32xf32>
    %333 = arith.subf %323, %332 : vector<8x32xf32>
    %334 = arith.mulf %333, %333 : vector<8x32xf32>
    %cst_128 = arith.constant dense<0.000000e+00> : vector<8xf32>
    %335 = vector.multi_reduction <add>, %334, %cst_128 [1] : vector<8x32xf32> to vector<8xf32>
    %336 = vector.shape_cast %335 : vector<8xf32> to vector<8x1xf32>
    %cst_129 = arith.constant 3.200000e+01 : f32
    %337 = vector.broadcast %cst_129 : f32 to vector<8x1xf32>
    %338 = arith.divf %336, %337 : vector<8x1xf32>
    %cst_130 = arith.constant 9.99999996E-13 : f32
    %339 = vector.broadcast %cst_130 : f32 to vector<8x1xf32>
    %340 = arith.addf %338, %339 : vector<8x1xf32>
    %341 = math.rsqrt %340 : vector<8x1xf32>
    %342 = vector.broadcast %341 : vector<8x1xf32> to vector<8x32xf32>
    %343 = arith.mulf %333, %342 : vector<8x32xf32>
    %344 = vector.broadcast %325 : vector<1x32xf32> to vector<8x32xf32>
    %345 = arith.mulf %343, %344 : vector<8x32xf32>
    %346 = vector.broadcast %327 : vector<1x32xf32> to vector<8x32xf32>
    %347 = arith.addf %345, %346 : vector<8x32xf32>
    %348 = arith.truncf %347 : vector<8x32xf32> to vector<8x32xbf16>
    %c1_131 = arith.constant 1 : index
    %c0_132 = arith.constant 0 : index
    %c0_133 = arith.constant 0 : index
    %349 = vector.load %arg11[%c1_131, %c0_132, %c0_133] : memref<2x32x128xbf16, #tpu.memory_space<vmem>>, vector<1x32x128xbf16>
    %350 = vector.shape_cast %349 : vector<1x32x128xbf16> to vector<32x128xbf16>
    %cst_134 = arith.constant dense<0.000000e+00> : vector<8x128xf32>
    %351 = tpu.matmul %348, %350, %cst_134 {dimension_numbers = #tpu.dot_dimension_numbers<[1], [0], [0], [1], [0, 0, 1, 1], [], []>} : vector<8x32xbf16>, vector<32x128xbf16>, vector<8x128xf32> -> vector<8x128xf32>
    %c1_135 = arith.constant 1 : index
    %c0_136 = arith.constant 0 : index
    %c0_137 = arith.constant 0 : index
    %352 = vector.load %arg12[%c1_135, %c0_136, %c0_137] : memref<2x1x128xf32, #tpu.memory_space<vmem>>, vector<1x1x128xf32>
    %353 = vector.shape_cast %352 : vector<1x1x128xf32> to vector<1x128xf32>
    %354 = vector.broadcast %353 : vector<1x128xf32> to vector<8x128xf32>
    %355 = arith.addf %351, %354 : vector<8x128xf32>
    %356 = arith.mulf %355, %355 : vector<8x128xf32>
    %357 = arith.mulf %355, %356 : vector<8x128xf32>
    %cst_138 = arith.constant 4.471500e-02 : f32
    %358 = vector.broadcast %cst_138 : f32 to vector<8x128xf32>
    %359 = arith.mulf %358, %357 : vector<8x128xf32>
    %360 = arith.addf %355, %359 : vector<8x128xf32>
    %cst_139 = arith.constant 0.797884583 : f32
    %361 = vector.broadcast %cst_139 : f32 to vector<8x128xf32>
    %362 = arith.mulf %361, %360 : vector<8x128xf32>
    %363 = math.tanh %362 : vector<8x128xf32>
    %cst_140 = arith.constant 1.000000e+00 : f32
    %364 = vector.broadcast %cst_140 : f32 to vector<8x128xf32>
    %365 = arith.addf %364, %363 : vector<8x128xf32>
    %cst_141 = arith.constant 5.000000e-01 : f32
    %366 = vector.broadcast %cst_141 : f32 to vector<8x128xf32>
    %367 = arith.mulf %366, %365 : vector<8x128xf32>
    %368 = arith.mulf %355, %367 : vector<8x128xf32>
    %369 = arith.truncf %368 : vector<8x128xf32> to vector<8x128xbf16>
    %c1_142 = arith.constant 1 : index
    %c0_143 = arith.constant 0 : index
    %c0_144 = arith.constant 0 : index
    %370 = vector.load %arg13[%c1_142, %c0_143, %c0_144] : memref<2x128x32xbf16, #tpu.memory_space<vmem>>, vector<1x128x32xbf16>
    %371 = vector.shape_cast %370 : vector<1x128x32xbf16> to vector<128x32xbf16>
    %cst_145 = arith.constant dense<0.000000e+00> : vector<8x32xf32>
    %372 = tpu.matmul %369, %371, %cst_145 {dimension_numbers = #tpu.dot_dimension_numbers<[1], [0], [0], [1], [0, 0, 1, 1], [], []>} : vector<8x128xbf16>, vector<128x32xbf16>, vector<8x32xf32> -> vector<8x32xf32>
    %c1_146 = arith.constant 1 : index
    %c0_147 = arith.constant 0 : index
    %c0_148 = arith.constant 0 : index
    %373 = vector.load %arg14[%c1_146, %c0_147, %c0_148] : memref<2x1x32xf32, #tpu.memory_space<vmem>>, vector<1x1x32xf32>
    %374 = vector.shape_cast %373 : vector<1x1x32xf32> to vector<1x32xf32>
    %375 = vector.broadcast %374 : vector<1x32xf32> to vector<8x32xf32>
    %376 = arith.addf %372, %375 : vector<8x32xf32>
    %377 = arith.addf %347, %376 : vector<8x32xf32>
    %c1_149 = arith.constant 1 : index
    %c0_150 = arith.constant 0 : index
    %c0_151 = arith.constant 0 : index
    %378 = vector.load %arg15[%c1_149, %c0_150, %c0_151] : memref<2x1x32xf32, #tpu.memory_space<vmem>>, vector<1x1x32xf32>
    %379 = vector.shape_cast %378 : vector<1x1x32xf32> to vector<1x32xf32>
    %c1_152 = arith.constant 1 : index
    %c0_153 = arith.constant 0 : index
    %c0_154 = arith.constant 0 : index
    %380 = vector.load %arg16[%c1_152, %c0_153, %c0_154] : memref<2x1x32xf32, #tpu.memory_space<vmem>>, vector<1x1x32xf32>
    %381 = vector.shape_cast %380 : vector<1x1x32xf32> to vector<1x32xf32>
    %cst_155 = arith.constant dense<0.000000e+00> : vector<8xf32>
    %382 = vector.multi_reduction <add>, %377, %cst_155 [1] : vector<8x32xf32> to vector<8xf32>
    %383 = vector.shape_cast %382 : vector<8xf32> to vector<8x1xf32>
    %cst_156 = arith.constant 3.200000e+01 : f32
    %384 = vector.broadcast %cst_156 : f32 to vector<8x1xf32>
    %385 = arith.divf %383, %384 : vector<8x1xf32>
    %386 = vector.broadcast %385 : vector<8x1xf32> to vector<8x32xf32>
    %387 = arith.subf %377, %386 : vector<8x32xf32>
    %388 = arith.mulf %387, %387 : vector<8x32xf32>
    %cst_157 = arith.constant dense<0.000000e+00> : vector<8xf32>
    %389 = vector.multi_reduction <add>, %388, %cst_157 [1] : vector<8x32xf32> to vector<8xf32>
    %390 = vector.shape_cast %389 : vector<8xf32> to vector<8x1xf32>
    %cst_158 = arith.constant 3.200000e+01 : f32
    %391 = vector.broadcast %cst_158 : f32 to vector<8x1xf32>
    %392 = arith.divf %390, %391 : vector<8x1xf32>
    %cst_159 = arith.constant 9.99999996E-13 : f32
    %393 = vector.broadcast %cst_159 : f32 to vector<8x1xf32>
    %394 = arith.addf %392, %393 : vector<8x1xf32>
    %395 = math.rsqrt %394 : vector<8x1xf32>
    %396 = vector.broadcast %395 : vector<8x1xf32> to vector<8x32xf32>
    %397 = arith.mulf %387, %396 : vector<8x32xf32>
    %398 = vector.broadcast %379 : vector<1x32xf32> to vector<8x32xf32>
    %399 = arith.mulf %397, %398 : vector<8x32xf32>
    %400 = vector.broadcast %381 : vector<1x32xf32> to vector<8x32xf32>
    %401 = arith.addf %399, %400 : vector<8x32xf32>
    %402 = vector.extract_strided_slice %401 {offsets = [0, 0], sizes = [7, 32], strides = [1, 1]} : vector<8x32xf32> to vector<7x32xf32>
    %403 = vector.extract_strided_slice %401 {offsets = [1, 0], sizes = [7, 32], strides = [1, 1]} : vector<8x32xf32> to vector<7x32xf32>
    %404 = tpu.concatenate %402, %403 in 1 : vector<7x32xf32>, vector<7x32xf32> -> vector<7x64xf32>
    %405 = arith.truncf %404 : vector<7x64xf32> to vector<7x64xbf16>
    %c0_160 = arith.constant 0 : index
    %c0_161 = arith.constant 0 : index
    %406 = vector.load %arg17[%c0_160, %c0_161] : memref<64x8xbf16, #tpu.memory_space<vmem>>, vector<64x8xbf16>
    %cst_162 = arith.constant dense<0.000000e+00> : vector<7x8xf32>
    %407 = tpu.matmul %405, %406, %cst_162 {dimension_numbers = #tpu.dot_dimension_numbers<[1], [0], [0], [1], [0, 0, 1, 1], [], []>} : vector<7x64xbf16>, vector<64x8xbf16>, vector<7x8xf32> -> vector<7x8xf32>
    %c0_163 = arith.constant 0 : index
    %c0_164 = arith.constant 0 : index
    %408 = vector.load %arg20[%c0_163, %c0_164] : memref<1x8xf32, #tpu.memory_space<vmem>>, vector<1x8xf32>
    %409 = vector.broadcast %408 : vector<1x8xf32> to vector<7x8xf32>
    %410 = arith.addf %407, %409 : vector<7x8xf32>
    %cst_165 = arith.constant 0.000000e+00 : f32
    %411 = vector.broadcast %cst_165 : f32 to vector<7x8xf32>
    %412 = arith.maximumf %410, %411 : vector<7x8xf32>
    %cst_166 = arith.constant dense<0xFF800000> : vector<8xf32>
    %413 = vector.multi_reduction <maximumf>, %412, %cst_166 [0] : vector<7x8xf32> to vector<8xf32>
    %414 = vector.shape_cast %413 : vector<8xf32> to vector<1x8xf32>
    %415 = vector.extract_strided_slice %401 {offsets = [0, 0], sizes = [6, 32], strides = [1, 1]} : vector<8x32xf32> to vector<6x32xf32>
    %416 = vector.extract_strided_slice %401 {offsets = [1, 0], sizes = [6, 32], strides = [1, 1]} : vector<8x32xf32> to vector<6x32xf32>
    %417 = vector.extract_strided_slice %401 {offsets = [2, 0], sizes = [6, 32], strides = [1, 1]} : vector<8x32xf32> to vector<6x32xf32>
    %418 = tpu.concatenate %415, %416, %417 in 1 : vector<6x32xf32>, vector<6x32xf32>, vector<6x32xf32> -> vector<6x96xf32>
    %419 = arith.truncf %418 : vector<6x96xf32> to vector<6x96xbf16>
    %c0_167 = arith.constant 0 : index
    %c0_168 = arith.constant 0 : index
    %420 = vector.load %arg18[%c0_167, %c0_168] : memref<96x8xbf16, #tpu.memory_space<vmem>>, vector<96x8xbf16>
    %cst_169 = arith.constant dense<0.000000e+00> : vector<6x8xf32>
    %421 = tpu.matmul %419, %420, %cst_169 {dimension_numbers = #tpu.dot_dimension_numbers<[1], [0], [0], [1], [0, 0, 1, 1], [], []>} : vector<6x96xbf16>, vector<96x8xbf16>, vector<6x8xf32> -> vector<6x8xf32>
    %c0_170 = arith.constant 0 : index
    %c0_171 = arith.constant 0 : index
    %422 = vector.load %arg21[%c0_170, %c0_171] : memref<1x8xf32, #tpu.memory_space<vmem>>, vector<1x8xf32>
    %423 = vector.broadcast %422 : vector<1x8xf32> to vector<6x8xf32>
    %424 = arith.addf %421, %423 : vector<6x8xf32>
    %cst_172 = arith.constant 0.000000e+00 : f32
    %425 = vector.broadcast %cst_172 : f32 to vector<6x8xf32>
    %426 = arith.maximumf %424, %425 : vector<6x8xf32>
    %cst_173 = arith.constant dense<0xFF800000> : vector<8xf32>
    %427 = vector.multi_reduction <maximumf>, %426, %cst_173 [0] : vector<6x8xf32> to vector<8xf32>
    %428 = vector.shape_cast %427 : vector<8xf32> to vector<1x8xf32>
    %429 = vector.extract_strided_slice %401 {offsets = [0, 0], sizes = [5, 32], strides = [1, 1]} : vector<8x32xf32> to vector<5x32xf32>
    %430 = vector.extract_strided_slice %401 {offsets = [1, 0], sizes = [5, 32], strides = [1, 1]} : vector<8x32xf32> to vector<5x32xf32>
    %431 = vector.extract_strided_slice %401 {offsets = [2, 0], sizes = [5, 32], strides = [1, 1]} : vector<8x32xf32> to vector<5x32xf32>
    %432 = vector.extract_strided_slice %401 {offsets = [3, 0], sizes = [5, 32], strides = [1, 1]} : vector<8x32xf32> to vector<5x32xf32>
    %433 = tpu.concatenate %429, %430, %431, %432 in 1 : vector<5x32xf32>, vector<5x32xf32>, vector<5x32xf32>, vector<5x32xf32> -> vector<5x128xf32>
    %434 = arith.truncf %433 : vector<5x128xf32> to vector<5x128xbf16>
    %c0_174 = arith.constant 0 : index
    %c0_175 = arith.constant 0 : index
    %435 = vector.load %arg19[%c0_174, %c0_175] : memref<128x8xbf16, #tpu.memory_space<vmem>>, vector<128x8xbf16>
    %cst_176 = arith.constant dense<0.000000e+00> : vector<5x8xf32>
    %436 = tpu.matmul %434, %435, %cst_176 {dimension_numbers = #tpu.dot_dimension_numbers<[1], [0], [0], [1], [0, 0, 1, 1], [], []>} : vector<5x128xbf16>, vector<128x8xbf16>, vector<5x8xf32> -> vector<5x8xf32>
    %c0_177 = arith.constant 0 : index
    %c0_178 = arith.constant 0 : index
    %437 = vector.load %arg22[%c0_177, %c0_178] : memref<1x8xf32, #tpu.memory_space<vmem>>, vector<1x8xf32>
    %438 = vector.broadcast %437 : vector<1x8xf32> to vector<5x8xf32>
    %439 = arith.addf %436, %438 : vector<5x8xf32>
    %cst_179 = arith.constant 0.000000e+00 : f32
    %440 = vector.broadcast %cst_179 : f32 to vector<5x8xf32>
    %441 = arith.maximumf %439, %440 : vector<5x8xf32>
    %cst_180 = arith.constant dense<0xFF800000> : vector<8xf32>
    %442 = vector.multi_reduction <maximumf>, %441, %cst_180 [0] : vector<5x8xf32> to vector<8xf32>
    %443 = vector.shape_cast %442 : vector<8xf32> to vector<1x8xf32>
    %444 = tpu.concatenate %414, %428, %443 in 1 : vector<1x8xf32>, vector<1x8xf32>, vector<1x8xf32> -> vector<1x24xf32>
    %445 = arith.truncf %444 : vector<1x24xf32> to vector<1x24xbf16>
    %c0_181 = arith.constant 0 : index
    %c0_182 = arith.constant 0 : index
    %446 = vector.load %arg23[%c0_181, %c0_182] : memref<24x128xbf16, #tpu.memory_space<vmem>>, vector<24x128xbf16>
    %cst_183 = arith.constant dense<0.000000e+00> : vector<1x128xf32>
    %447 = tpu.matmul %445, %446, %cst_183 {dimension_numbers = #tpu.dot_dimension_numbers<[1], [0], [0], [1], [0, 0, 1, 1], [], []>} : vector<1x24xbf16>, vector<24x128xbf16>, vector<1x128xf32> -> vector<1x128xf32>
    %c0_184 = arith.constant 0 : index
    %c0_185 = arith.constant 0 : index
    %448 = vector.load %arg24[%c0_184, %c0_185] : memref<1x128xf32, #tpu.memory_space<vmem>>, vector<1x128xf32>
    %449 = arith.addf %447, %448 : vector<1x128xf32>
    %c0_186 = arith.constant 0 : index
    %c0_187 = arith.constant 0 : index
    %c0_188 = arith.constant 0 : index
    %450 = vector.load %arg25[%c0_186, %c0_187, %c0_188] : memref<1x1x128xf32, #tpu.memory_space<vmem>>, vector<1x1x128xf32>
    %451 = vector.shape_cast %450 : vector<1x1x128xf32> to vector<1x128xf32>
    %452 = vector.shape_cast %449 : vector<1x128xf32> to vector<1x1x128xf32>
    tpu.vector_store %arg25[%c0_186, %c0_187, %c0_188], %452 {strides = array<i32>} : memref<1x1x128xf32, #tpu.memory_space<vmem>>, vector<1x1x128xf32>,
    return
  }
  func.func @transform_0(%arg0: i32) -> (i32, i32, i32) {
    %c0_i32 = arith.constant 0 : i32
    %c0_i32_0 = arith.constant 0 : i32
    %c0_i32_1 = arith.constant 0 : i32
    return %arg0, %c0_i32, %c0_i32_0 : i32, i32, i32
  }
  func.func @transform_1(%arg0: i32) -> (i32, i32, i32) {
    %c0_i32 = arith.constant 0 : i32
    %c0_i32_0 = arith.constant 0 : i32
    %c0_i32_1 = arith.constant 0 : i32
    return %arg0, %c0_i32, %c0_i32_0 : i32, i32, i32
  }
  func.func @transform_2(%arg0: i32) -> (i32, i32) {
    %c0_i32 = arith.constant 0 : i32
    %c0_i32_0 = arith.constant 0 : i32
    %c0_i32_1 = arith.constant 0 : i32
    return %c0_i32, %c0_i32_0 : i32, i32
  }
  func.func @transform_3(%arg0: i32) -> (i32, i32) {
    %c0_i32 = arith.constant 0 : i32
    %c0_i32_0 = arith.constant 0 : i32
    %c0_i32_1 = arith.constant 0 : i32
    return %c0_i32, %c0_i32_0 : i32, i32
  }
  func.func @transform_4(%arg0: i32) -> (i32, i32, i32) {
    %c0_i32 = arith.constant 0 : i32
    %c0_i32_0 = arith.constant 0 : i32
    %c0_i32_1 = arith.constant 0 : i32
    %c0_i32_2 = arith.constant 0 : i32
    return %c0_i32, %c0_i32_0, %c0_i32_1 : i32, i32, i32
  }
  func.func @transform_5(%arg0: i32) -> (i32, i32, i32) {
    %c0_i32 = arith.constant 0 : i32
    %c0_i32_0 = arith.constant 0 : i32
    %c0_i32_1 = arith.constant 0 : i32
    %c0_i32_2 = arith.constant 0 : i32
    return %c0_i32, %c0_i32_0, %c0_i32_1 : i32, i32, i32
  }
  func.func @transform_6(%arg0: i32) -> (i32, i32, i32) {
    %c0_i32 = arith.constant 0 : i32
    %c0_i32_0 = arith.constant 0 : i32
    %c0_i32_1 = arith.constant 0 : i32
    %c0_i32_2 = arith.constant 0 : i32
    return %c0_i32, %c0_i32_0, %c0_i32_1 : i32, i32, i32
  }
  func.func @transform_7(%arg0: i32) -> (i32, i32, i32) {
    %c0_i32 = arith.constant 0 : i32
    %c0_i32_0 = arith.constant 0 : i32
    %c0_i32_1 = arith.constant 0 : i32
    %c0_i32_2 = arith.constant 0 : i32
    return %c0_i32, %c0_i32_0, %c0_i32_1 : i32, i32, i32
  }
  func.func @transform_8(%arg0: i32) -> (i32, i32, i32) {
    %c0_i32 = arith.constant 0 : i32
    %c0_i32_0 = arith.constant 0 : i32
    %c0_i32_1 = arith.constant 0 : i32
    %c0_i32_2 = arith.constant 0 : i32
    return %c0_i32, %c0_i32_0, %c0_i32_1 : i32, i32, i32
  }
  func.func @transform_9(%arg0: i32) -> (i32, i32, i32) {
    %c0_i32 = arith.constant 0 : i32
    %c0_i32_0 = arith.constant 0 : i32
    %c0_i32_1 = arith.constant 0 : i32
    %c0_i32_2 = arith.constant 0 : i32
    return %c0_i32, %c0_i32_0, %c0_i32_1 : i32, i32, i32
  }
  func.func @transform_10(%arg0: i32) -> (i32, i32, i32) {
    %c0_i32 = arith.constant 0 : i32
    %c0_i32_0 = arith.constant 0 : i32
    %c0_i32_1 = arith.constant 0 : i32
    %c0_i32_2 = arith.constant 0 : i32
    return %c0_i32, %c0_i32_0, %c0_i32_1 : i32, i32, i32
  }
  func.func @transform_11(%arg0: i32) -> (i32, i32, i32) {
    %c0_i32 = arith.constant 0 : i32
    %c0_i32_0 = arith.constant 0 : i32
    %c0_i32_1 = arith.constant 0 : i32
    %c0_i32_2 = arith.constant 0 : i32
    return %c0_i32, %c0_i32_0, %c0_i32_1 : i32, i32, i32
  }
  func.func @transform_12(%arg0: i32) -> (i32, i32, i32) {
    %c0_i32 = arith.constant 0 : i32
    %c0_i32_0 = arith.constant 0 : i32
    %c0_i32_1 = arith.constant 0 : i32
    %c0_i32_2 = arith.constant 0 : i32
    return %c0_i32, %c0_i32_0, %c0_i32_1 : i32, i32, i32
  }
  func.func @transform_13(%arg0: i32) -> (i32, i32, i32) {
    %c0_i32 = arith.constant 0 : i32
    %c0_i32_0 = arith.constant 0 : i32
    %c0_i32_1 = arith.constant 0 : i32
    %c0_i32_2 = arith.constant 0 : i32
    return %c0_i32, %c0_i32_0, %c0_i32_1 : i32, i32, i32
  }
  func.func @transform_14(%arg0: i32) -> (i32, i32, i32) {
    %c0_i32 = arith.constant 0 : i32
    %c0_i32_0 = arith.constant 0 : i32
    %c0_i32_1 = arith.constant 0 : i32
    %c0_i32_2 = arith.constant 0 : i32
    return %c0_i32, %c0_i32_0, %c0_i32_1 : i32, i32, i32
  }
  func.func @transform_15(%arg0: i32) -> (i32, i32, i32) {
    %c0_i32 = arith.constant 0 : i32
    %c0_i32_0 = arith.constant 0 : i32
    %c0_i32_1 = arith.constant 0 : i32
    %c0_i32_2 = arith.constant 0 : i32
    return %c0_i32, %c0_i32_0, %c0_i32_1 : i32, i32, i32
  }
  func.func @transform_16(%arg0: i32) -> (i32, i32) {
    %c0_i32 = arith.constant 0 : i32
    %c0_i32_0 = arith.constant 0 : i32
    %c0_i32_1 = arith.constant 0 : i32
    return %c0_i32, %c0_i32_0 : i32, i32
  }
  func.func @transform_17(%arg0: i32) -> (i32, i32) {
    %c0_i32 = arith.constant 0 : i32
    %c0_i32_0 = arith.constant 0 : i32
    %c0_i32_1 = arith.constant 0 : i32
    return %c0_i32, %c0_i32_0 : i32, i32
  }
  func.func @transform_18(%arg0: i32) -> (i32, i32) {
    %c0_i32 = arith.constant 0 : i32
    %c0_i32_0 = arith.constant 0 : i32
    %c0_i32_1 = arith.constant 0 : i32
    return %c0_i32, %c0_i32_0 : i32, i32
  }
  func.func @transform_19(%arg0: i32) -> (i32, i32) {
    %c0_i32 = arith.constant 0 : i32
    %c0_i32_0 = arith.constant 0 : i32
    %c0_i32_1 = arith.constant 0 : i32
    return %c0_i32, %c0_i32_0 : i32, i32
  }
  func.func @transform_20(%arg0: i32) -> (i32, i32) {
    %c0_i32 = arith.constant 0 : i32
    %c0_i32_0 = arith.constant 0 : i32
    %c0_i32_1 = arith.constant 0 : i32
    return %c0_i32, %c0_i32_0 : i32, i32
  }
  func.func @transform_21(%arg0: i32) -> (i32, i32) {
    %c0_i32 = arith.constant 0 : i32
    %c0_i32_0 = arith.constant 0 : i32
    %c0_i32_1 = arith.constant 0 : i32
    return %c0_i32, %c0_i32_0 : i32, i32
  }
  func.func @transform_22(%arg0: i32) -> (i32, i32) {
    %c0_i32 = arith.constant 0 : i32
    %c0_i32_0 = arith.constant 0 : i32
    %c0_i32_1 = arith.constant 0 : i32
    return %c0_i32, %c0_i32_0 : i32, i32
  }
  func.func @transform_23(%arg0: i32) -> (i32, i32) {
    %c0_i32 = arith.constant 0 : i32
    %c0_i32_0 = arith.constant 0 : i32
    %c0_i32_1 = arith.constant 0 : i32
    return %c0_i32, %c0_i32_0 : i32, i32
  }
  func.func @transform_24(%arg0: i32) -> (i32, i32, i32) {
    %c0_i32 = arith.constant 0 : i32
    %c0_i32_0 = arith.constant 0 : i32
    %c0_i32_1 = arith.constant 0 : i32
    return %arg0, %c0_i32, %c0_i32_0 : i32, i32, i32
  }
}

</mosaic_0001>

<bundles_post_ra>
// kernel: bert_text_model_forward.1
= control target key start
LH: loop header
LB: loop body
LE: loop exit
PB: predicated region body
PF: predicated region fallthrough
CT: control target
= control target key end

     0   :  { %s3318_s0 = inlined_call_operand.vmem [shape: f32[2,8,32], index: 0, kind: input, shape index: {}]   ;;  %s3319_s1 = inlined_call_operand.vmem [shape: f32[2,1,8], index: 1, kind: input, shape index: {}]   ;;  %s3320_s2 = inlined_call_operand.vmem [shape: f32[1,32], index: 2, kind: input, shape index: {}]   ;;  %s3321_s3 = inlined_call_operand.vmem [shape: f32[1,32], index: 3, kind: input, shape index: {}]   ;;  %s3322_s4 = inlined_call_operand.vmem [shape: bf16[2,32,128], index: 4, kind: input, shape index: {}]   ;;  %s3323_s5 = inlined_call_operand.vmem [shape: f32[2,1,128], index: 5, kind: input, shape index: {}, may-alias: {5,11}]   ;;  %s3324_s6 = inlined_call_operand.vmem [shape: bf16[2,32,32], index: 6, kind: input, shape index: {}]   ;;  %s3325_s7 = inlined_call_operand.vmem [shape: f32[2,1,32], index: 7, kind: input, shape index: {}, may-alias: {7,9,13,15}]   ;;  %s3326_s8 = inlined_call_operand.vmem [shape: f32[2,1,32], index: 8, kind: input, shape index: {}, may-alias: {8,14}]   ;;  %s3327_s9 = inlined_call_operand.vmem [shape: f32[2,1,32], index: 9, kind: input, shape index: {}, may-alias: {7,9,13,15}]   ;;  %s3328_s10 = inlined_call_operand.vmem [shape: bf16[2,32,128], index: 10, kind: input, shape index: {}]   ;;  %s3329_s11 = inlined_call_operand.vmem [shape: f32[2,1,128], index: 11, kind: input, shape index: {}, may-alias: {5,11}]   ;;  %s3330_s12 = inlined_call_operand.vmem [shape: bf16[2,128,32], index: 12, kind: input, shape index: {}]   ;;  %s3331_s13 = inlined_call_operand.vmem [shape: f32[2,1,32], index: 13, kind: input, shape index: {}, may-alias: {7,9,13,15}]   ;;  %s3332_s14 = inlined_call_operand.vmem [shape: f32[2,1,32], index: 14, kind: input, shape index: {}, may-alias: {8,14}]   ;;  %s3333_s15 = inlined_call_operand.vmem [shape: f32[2,1,32], index: 15, kind: input, shape index: {}, may-alias: {7,9,13,15}]   ;;  %s3334_s16 = inlined_call_operand.vmem [shape: bf16[64,8], index: 16, kind: input, shape index: {}]   ;;  %s3335_s17 = inlined_call_operand.vmem [shape: bf16[96,8], index: 17, kind: input, shape index: {}]   ;;  %s3336_s18 = inlined_call_operand.vmem [shape: bf16[128,8], index: 18, kind: input, shape index: {}]   ;;  %s3337_s19 = inlined_call_operand.vmem [shape: f32[1,8], index: 19, kind: input, shape index: {}, may-alias: {19,20,21}]   ;;  %s3338_s20 = inlined_call_operand.vmem [shape: f32[1,8], index: 20, kind: input, shape index: {}, may-alias: {19,20,21}]   ;;  %s3339_s21 = inlined_call_operand.vmem [shape: f32[1,8], index: 21, kind: input, shape index: {}, may-alias: {19,20,21}]   ;;  %s3340_s22 = inlined_call_operand.vmem [shape: bf16[24,128], index: 22, kind: input, shape index: {}]   ;;  %s3341_s23 = inlined_call_operand.vmem [shape: f32[1,128], index: 23, kind: input, shape index: {}]   ;;  %s3342_s24 = inlined_call_operand.hbm [shape: f32[2,1,128], index: 24, kind: output, shape index: {}]  }
   0x1   :  { %3379 = sst [smem:[#allocation12_spill]] %s3318_s0 }
   0x2   :  { %3380 = sst [smem:[#allocation13_spill]] %s3319_s1 }
   0x3   :  { %3381 = sst [smem:[#allocation14_spill]] %s3320_s2 }
   0x4   :  { %3382 = sst [smem:[#allocation15_spill]] %s3321_s3 }
   0x5   :  { %3383 = sst [smem:[#allocation16_spill]] %s3322_s4 }
   0x6   :  { %3384 = sst [smem:[#allocation17_spill]] %s3323_s5 }
   0x7   :  { %3385 = sst [smem:[#allocation18_spill]] %s3324_s6 }
   0x8   :  { %3386 = sst [smem:[#allocation19_spill]] %s3325_s7 }
   0x9   :  { %3387 = sst [smem:[#allocation20_spill]] %s3326_s8 }
   0xa   :  { %3388 = sst [smem:[#allocation21_spill]] %s3327_s9 }
   0xb   :  { %3389 = sst [smem:[#allocation22_spill]] %s3328_s10 }
   0xc   :  { %3390 = sst [smem:[#allocation23_spill]] %s3329_s11 }
   0xd   :  { %3391 = sst [smem:[#allocation24_spill]] %s3341_s23 }
   0xe   :  { %3392 = sst [smem:[#allocation25_spill]] %s3342_s24 }
   0xf   :  { %29 = vsyncpa [#allocation3], 0 }
  0x10   :  { %31 = vsyncpa [#allocation3 + $0x1], 0  ;;  %s2841_s5 = smov 0   ;;  %s2843_s26 = smov 0  }
  0x11   :  { %s2845_s27 = smov 0   ;;  %s2847_s28 = smov 0  }
  0x12 LB: > { %3393 = sst [smem:[#allocation5_spill]] %s2686_s5  ;;  %s2862_s6 = sadd.s32 4294967295, %s2698_s28   ;;  %s2698_s28 = sphi %s2847_s28, %s3437_s28   ;;  %s2694_s27 = sphi %s2845_s27, %s3439_s27   ;;  %s2690_s26 = sphi %s2843_s26, %s3441_s26   ;;  %s2686_s5 = sphi %s2841_s5, %s3440_s5  }
  0x13   : > { %3394 = sst [smem:[#allocation6_spill]] %s2694_s27  ;;  %s2208_s2 = sadd.s32 4294967294, %s2698_s28  }
  0x14   : > { %3395 = sst [smem:[#allocation7_spill]] %s2698_s28  ;;  %s2866_s29 = sadd.s32 1, %s2698_s28  }
  0x15   : > { %3396 = sst [smem:[#allocation8_spill]] %s2866_s29  ;;  %s558_s0 = sadd.s32 1, %s2694_s27 }
  0x16   : > { %s555_s7 = ssub.s32 %s2698_s28, %s2866_s29  ;;  %p568_p0 = scmp.ne.s32.totalorder %s2694_s27, %s2690_s26 }
  0x17   : > { %p556_p1 = scmp.eq.s32.totalorder %s555_s7, 0  ;;  %p569_p2 = scmp.eq.s32.totalorder %s2862_s6, 1 }
  0x18   : > { %p574_p3 = scmp.ne.s32.totalorder %s2690_s26, %s2686_s5  ;;  %p575_p4 = scmp.eq.s32.totalorder %s2208_s2, 1 }
  0x19   : > { %s2877_s30 = scalar_select %p556_p1, %s2694_s27, %s558_s0  }
  0x1a   : > { %p2879_p5 = por %p569_p2, %p568_p0  ;;  %p2883_p6 = por %p575_p4, %p574_p3 }
  0x1b   : > { %3397 = sst [smem:[#allocation9_spill]] %s2877_s30  ;;  %p2211_p7 = scmp.ge.s32.totalorder %s2698_s28, 1 }
  0x1c   : > { %s3398_s3 = scalar_select %p2879_p5, 1, 0 }
  0x1d   : > { %s3400_s25 = scalar_select %p2883_p6, 1, 0 }
  0x1e   : > { %3399 = sst [smem:[#allocation10_spill]] %s3398_s3  ;;  %p672_p8 = scmp.lt.s32.totalorder %s2698_s28, 3 }
  0x1f   : > { %3401 = sst [smem:[#allocation11_spill]] %s3400_s25 }
  0x20   : > { %p673_p9 = pnand %p2211_p7, %p672_p8 }
  0x21   : > { %p739_p10 = scmp.lt.s32.totalorder (!%p673_p9), %s2862_s6, 1  ;;  %s3402_s0 = sld [smem:[#allocation13_spill]] (!%p673_p9) }
  0x22   : > { %676 = sbr.rel (%p673_p9) target bundleno = 4980 (0x1374), region = 116  ;;  %s3403_s29 = sld [smem:[#allocation12_spill]] (!%p673_p9) }
  0x23   : > { %s3404_s30 = sld [smem:[#allocation16_spill]] (!%p673_p9)  ;;  %s3355_s1 = smov (!%p673_p9), 104  }
  0x24   : > { %s3405_s27 = sld [smem:[#allocation14_spill]] (!%p673_p9)  ;;  %s3363_s2 = smov (!%p673_p9), 120  }
  0x25   : > { %s3407_s28 = sld [smem:[#allocation17_spill]] (!%p673_p9)  ;;  %s3360_s5 = smov (!%p673_p9), 88  }
  0x26   : > { %s3362_s7 = smov (!%p673_p9), 80   ;;  %s3412_s10 = sld [smem:[#allocation22_spill]] (!%p673_p9) }
  0x27   : > { %s2891_s8 = scalar_select %p739_p10, %s2862_s6, 1  ;;  %vm750_vm0 = vcmask 261120   ;;  %v2700_v2 = vmov 32.0   ;;  %vm830_vm5 = vcmask 64512   ;;  %vm872_vm6 = vcmask 1043456  }
  0x28   : > { %2588 = vrcp.f32 %v2700_v2  ;;  %vm1076_vm7 = vcmask 130048   ;;  %vm1078_vm8 = vcmask 195584   ;;  %s3415_s9 = sld [smem:[#allocation21_spill]]  ;;  %s3425_s24 = smov 56  }
  0x29   : > { %s2212_s4 = sshll.u32 %s2891_s8, 3  ;;  %v2465_v14 = vld [vmem:[%s3404_s30 + $0x8] sm:$0xff]  ;;  %v2464_v15 = vld [vmem:[%s3404_s30] sm:$0xff]  ;;  %s3416_s11 = sld [smem:[#allocation23_spill]] }
  0x2a   : > { %s742_s25 = scalar_lea.vmem %s3403_s29, %s2212_s4  ;;  %819 = vmatpush.bf16.msra.mxu0 %v2465_v14  ;;  %v2567_v25 = vld [vmem:[%s3405_s27] ss:$0 sm:$0xff]  ;;  %s3406_s4 = sld [smem:[#allocation15_spill]] }
  0x2b   : > { %v747_v0 = vld [vmem:[%s742_s25] sm:$0xff]  ;;  %s3408_s23 = smov %s3407_s28  ;;  %s3371_s27 = smov 96  }
  0x2c   : > { %v751_v1 = vsel %vm750_vm0, %v747_v0, 0.0  ;;  %v2569_v32 = vld [vmem:[%s3407_s28] ss:$0 sm:$0xff]  ;;  %s3361_s29 = smov 72   ;;  %s3359_s28 = smov 112  }
  0x2d   : > { %752 = vadd.xlane.f32.xlu0 %v751_v1  ;;  %s3357_s25 = smov 40   ;;  %s3426_s3 = smov 40  }
  0x2e   : > { %v2589_v3 = vpop.eup %2588  ;;  %820 = vmatpush.bf16.msra.mxu0 %v2464_v15 }
  0x2f   : > { %v755_v4 = vmul.f32 32.0, %v2589_v3  ;;  %vm759_vm1 = vweird.f32 %v2589_v3 }
  0x30   : > { %v2568_v28 = vld [vmem:[%s3406_s4] ss:$0 sm:$0xff]  ;;  %s3356_s4 = smov 48  }
  0x31   : > { %v756_v5 = vsub.f32 1.0, %v755_v4 }
  0x33   : > { %v757_v6 = vmul.f32 %v2589_v3, %v756_v5 }
  0x35   : > { %v758_v7 = vadd.f32 %v2589_v3, %v757_v6 }
  0x37   : > { %v2902_v8 = vsel %vm759_vm1, %v2589_v3, %v758_v7 }
  0xa0   : > { %v753_v9 = vpop.xlane.xlu0 %752 }
  0xa1   : > { %v761_v10 = vmul.f32 %v2902_v8, %v753_v9 }
  0xa3   : > { %v762_v11 = vsub.f32 %v747_v0, %v761_v10 }
  0xa5   : > { %v763_v12 = vmul.f32 %v762_v11, %v762_v11 }
  0xa7   : > { %v764_v13 = vsel %vm750_vm0, %v763_v12, 0.0 }
  0xa8   : > { %765 = vadd.xlane.f32.xlu0 %v764_v13 }
 0x11b   : > { %v766_v16 = vpop.xlane.xlu0 %765 }
 0x11c   : > { %v767_v17 = vmul.f32 %v766_v16, %v2902_v8 }
 0x11e   : > { %v768_v18 = vadd.f32 1e-12, %v767_v17 }
 0x120   : > { %2590 = vrsqrt.f32 %v768_v18  ;;  %vm775_vm3 = vweird.f32 %v768_v18 }
 0x126   : > { %v2591_v19 = vpop.eup %2590 }
 0x127   : > { %v770_v20 = vmul.f32 %v2591_v19, %v768_v18  ;;  %vm776_vm2 = vweird.f32 %v2591_v19 }
 0x128   : > { %vm777_vm4 = vmor %vm775_vm3, %vm776_vm2 }
 0x129   : > { %v771_v21 = vmul.f32 %v2591_v19, %v770_v20 }
 0x12b   : > { %v772_v22 = vmul.f32 0.5, %v771_v21 }
 0x12d   : > { %v773_v23 = vsub.f32 1.5, %v772_v22 }
 0x12f   : > { %v774_v24 = vmul.f32 %v2591_v19, %v773_v23 }
 0x131   : > { %v778_v26 = vsel %vm777_vm4, %v2591_v19, %v774_v24 }
 0x132   : > { %v779_v27 = vmul.f32 %v778_v26, %v762_v11 }
 0x134   : > { %v783_v29 = vmul.f32 %v2567_v25, %v779_v27 }
 0x136   : > { %v2919_v30 = vadd.f32 %v2568_v28, %v783_v29 }
 0x138   : > { %v789_v31 = vpack.c.bf16 %v2919_v30, %v2919_v30 }
 0x13a   : > { %2221 = vmatmul.msk.bf16.vlgmr.msra.gmra.mxu0 %vm750_vm0, %v789_v31 }
 0x1b7   : > { %v822_v33 = vpop.f32.mrf.mxu0 }
 0x1b8   : > { %v823_v34 = vadd.f32 %v2569_v32, %v822_v33 }
 0x1ba   : > { %v2927_v35 = vpack.c.bf16 %v823_v34, %v823_v34 }
 0x1bc   : > { %1005 = vrot.lane.b32.xlu0 %v2927_v35, %s3355_s1  ;;  %889 = vrot.lane.b32.xlu2 %v2927_v35, %s3363_s2  ;;  %s3409_s1 = scalar_lea.vmem %s3402_s0, %s2891_s8  ;;  %s3369_s8 = smov 64  }
 0x1bd   : > { %828 = vrot.lane.b32.xlu1 %v2927_v35, %s3371_s27  ;;  %v2957_v48 = vld [vmem:[%s3409_s1] ss:$0 sm:$0xff]  ;;  %s3358_s1 = smov 56   ;;  %s3419_s27 = smov 120  }
 0x1be   : > { %s3421_s0 = smov 72   ;;  %s3422_s2 = smov 88  }
 0x1bf   : > { %v824_v36 = vpop.f32.mrf.mxu0 }
 0x1c4   : > { %1007 = vrot.lane.b32.xlu2 %v2927_v35, %s3361_s29  ;;  %s3410_s29 = sld [smem:[#allocation18_spill]] }
 0x1c5   : > { %891 = vrot.lane.b32.xlu1 %v2927_v35, %s3360_s5  ;;  %s3413_s5 = sld [smem:[#allocation20_spill]] }
 0x1cc   : > { %947 = vrot.lane.b32.xlu2 %v2927_v35, %s3359_s28  ;;  %s3420_s28 = smov 80  }
 0x1cd   : > { %949 = vrot.lane.b32.xlu1 %v2927_v35, %s3362_s7  ;;  %s3423_s7 = smov 112  }
 0x216   : > { %v890_v37 = vpop.permute.xlu2 %889 }
 0x21e   : > { %v1008_v40 = vpop.permute.xlu2 %1007 }
 0x21f   : > { %v1013_v43 = vsel %vm830_vm5, %v1008_v40, 0 }
 0x226   : > { %v948_v46 = vpop.permute.xlu2 %947 }
 0x22e   : > { %v1006_v47 = vpop.permute.xlu0 %1005 }
 0x22f   : > { %v829_v38 = vpop.permute.xlu1 %828 }
 0x230   : > { %v835_v39 = vsel %vm830_vm5, %v829_v38, 0 }
 0x231   : > { %844 = vmatpush.bf16.xpose.msra.mxu1 %v835_v39 }
 0x237   : > { %v892_v41 = vpop.permute.xlu1 %891 }
 0x238   : > { %2222 = vmatmul.msk.bf16.vlgmr.msra.gmra.mxu1 %vm830_vm5, %v2927_v35  ;;  %v897_v42 = vsel %vm830_vm5, %v892_v41, 0 }
 0x239   : > { %906 = vmatpush.bf16.xpose.msra.mxu3 %v897_v42 }
 0x23f   : > { %v950_v44 = vpop.permute.xlu1 %949 }
 0x240   : > { %2224 = vmatmul.msk.bf16.vlgmr.msra.gmra.mxu3 %vm830_vm5, %v890_v37  ;;  %v955_v45 = vsel %vm830_vm5, %v950_v44, 0 }
 0x241   : > { %1022 = vmatpush.bf16.xpose.msrb.mxu3 %v1013_v43  ;;  %964 = vmatpush.bf16.xpose.msrb.mxu0 %v955_v45 }
 0x248   : > { %2226 = vmatmul.msk.bf16.vlgmr.msrb.gmra.mxu0 %vm830_vm5, %v948_v46 }
 0x250   : > { %2228 = vmatmul.msk.bf16.vlgmr.msrb.gmra.mxu3 %vm830_vm5, %v1006_v47 }
 0x2b5   : > { %v846_v49 = vpop.f32.mrf.mxu1 }
 0x2b6   : > { %v850_v50 = vmul.f32 0.35355338, %v846_v49 }
 0x2b8   : > { %v854_v51 = vadd.f32 %v2957_v48, %v850_v50 }
 0x2ba   : > { %v855_v52 = vsel %vm830_vm5, %v854_v51, -inf }
 0x2bb   : > { %856 = vmax.xlane.f32.xlu1 %v855_v52 }
 0x2bd   : > { %v848_v53 = vpop.f32.mrf.mxu1 }
 0x2c3   : > { %v908_v54 = vpop.f32.mrf.mxu3 }
 0x2c4   : > { %v912_v55 = vmul.f32 0.35355338, %v908_v54 }
 0x2c5   : > { %v966_v56 = vpop.f32.mrf.mxu0 }
 0x2c6   : > { %v913_v57 = vadd.f32 %v2957_v48, %v912_v55  ;;  %v970_v58 = vmul.f32 0.35355338, %v966_v56 }
 0x2c8   : > { %v914_v59 = vsel %vm830_vm5, %v913_v57, -inf  ;;  %v971_v61 = vadd.f32 %v2957_v48, %v970_v58 }
 0x2c9   : > { %915 = vmax.xlane.f32.xlu2 %v914_v59 }
 0x2ca   : > { %v972_v63 = vsel %vm830_vm5, %v971_v61, -inf }
 0x2cb   : > { %v910_v60 = vpop.f32.mrf.mxu3 }
 0x2cc   : > { %v2467_v60 = vld [vmem:[%s3410_s29 + $0x8] sm:$0xff] }
 0x2cd   : > { %v968_v62 = vpop.f32.mrf.mxu0  ;;  %1110 = vmatpush.bf16.msra.mxu0 %v2467_v60 }
 0x2d1   : > { %973 = vmax.xlane.f32.xlu2 %v972_v63 }
 0x2d3   : > { %v1024_v0 = vpop.f32.mrf.mxu3 }
 0x2d4   : > { %v1028_v1 = vmul.f32 0.35355338, %v1024_v0 }
 0x2d6   : > { %v1029_v2 = vadd.f32 %v2957_v48, %v1028_v1 }
 0x2d8   : > { %v1030_v3 = vsel %vm830_vm5, %v1029_v2, -inf }
 0x2d9   : > { %1031 = vmax.xlane.f32.xlu0 %v1030_v3 }
 0x2db   : > { %v1026_v4 = vpop.f32.mrf.mxu3 }
 0x2e9   : > { %867 = vrot.lane.b32.xlu2 %v2927_v35, %s3369_s8  ;;  %s3414_s8 = smov %s3413_s5 }
 0x2ed   : > { %926 = vrot.lane.b32.xlu0 %v2927_v35, %s3358_s1  ;;  %s3364_s1 = smov 16  }
 0x2f1   : > { %1042 = vrot.lane.b32.xlu2 %v2927_v35, %s3357_s25  ;;  %s3366_s25 = smov 24  }
 0x2f5   : > { %984 = vrot.lane.b32.xlu0 %v2927_v35, %s3356_s4  ;;  %s3367_s4 = smov 8  }
 0x32e   : > { %v857_v5 = vpop.xlane.xlu1 %856 }
 0x32f   : > { %v858_v6 = vsub.f32 %v854_v51, %v857_v5 }
 0x331   : > { %v859_v7 = vmul.f32 1.442695, %v858_v6 }
 0x333   : > { %2592 = vpow2.f32 %v859_v7 }
 0x339   : > { %v2593_v9 = vpop.eup %2592 }
 0x33a   : > { %v861_v10 = vsel %vm830_vm5, %v2593_v9, 0.0 }
 0x33b   : > { %862 = vadd.xlane.f32.xlu1 %v861_v10 }
 0x33c   : > { %v916_v11 = vpop.xlane.xlu2 %915 }
 0x33d   : > { %v917_v12 = vsub.f32 %v913_v57, %v916_v11 }
 0x33f   : > { %v918_v13 = vmul.f32 1.442695, %v917_v12 }
 0x341   : > { %2594 = vpow2.f32 %v918_v13 }
 0x344   : > { %v974_v14 = vpop.xlane.xlu2 %973 }
 0x345   : > { %v975_v21 = vsub.f32 %v971_v61, %v974_v14  ;;  %v2466_v61 = vld [vmem:[%s3410_s29] sm:$0xff] }
 0x346   : > { %1111 = vmatpush.bf16.msra.mxu0 %v2466_v61 }
 0x347   : > { %v2595_v15 = vpop.eup %2594  ;;  %v976_v23 = vmul.f32 1.442695, %v975_v21 }
 0x348   : > { %v920_v16 = vsel %vm830_vm5, %v2595_v15, 0.0 }
 0x349   : > { %921 = vadd.xlane.f32.xlu1 %v920_v16 }
 0x34c   : > { %v1032_v17 = vpop.xlane.xlu0 %1031  ;;  %v868_v18 = vpop.permute.xlu2 %867 }
 0x34d   : > { %v1033_v19 = vsub.f32 %v1029_v2, %v1032_v17  ;;  %v874_v20 = vsel %vm872_vm6, %v868_v18, 0  ;;  %v2469_v17 = vld [vmem:[%s3412_s10 + $0x8] sm:$0xff]  ;;  %v2477_v18 = vld [vmem:[%s3330_s12 + $0x38] sm:$0xff] }
 0x34e   : > { %883 = vmatpush.bf16.msra.mxu2 %v874_v20  ;;  %1265 = vmatpush.bf16.msra.mxu3 %v2477_v18  ;;  %v2576_v18 = vld [vmem:[%s3333_s15] ss:$0 sm:$0xff] }
 0x34f   : > { %v1034_v22 = vmul.f32 1.442695, %v1033_v19 }
 0x351   : > { %2596 = vpow2.f32 %v1034_v22 }
 0x352   : > { %2598 = vpow2.f32 %v976_v23 }
 0x354   : > { %v1043_v36 = vpop.permute.xlu2 %1042 }
 0x355   : > { %v1048_v38 = vsel %vm872_vm6, %v1043_v36, 0  ;;  %v2476_v36 = vld [vmem:[%s3330_s12 + $0x30] sm:$0xff] }
 0x356   : > { %1266 = vmatpush.bf16.msra.mxu3 %v2476_v36 }
 0x357   : > { %v2597_v24 = vpop.eup %2596 }
 0x358   : > { %v1036_v25 = vsel %vm830_vm5, %v2597_v24, 0.0  ;;  %v2599_v26 = vpop.eup %2598 }
 0x359   : > { %1037 = vadd.xlane.f32.xlu1 %v1036_v25  ;;  %v978_v29 = vsel %vm830_vm5, %v2599_v26, 0.0 }
 0x35f   : > { %v927_v27 = vpop.permute.xlu0 %926 }
 0x360   : > { %v932_v28 = vsel %vm872_vm6, %v927_v27, 0 }
 0x361   : > { %941 = vmatpush.bf16.msrb.mxu2 %v932_v28  ;;  %979 = vadd.xlane.f32.xlu1 %v978_v29  ;;  %v2571_v28 = vld [vmem:[%s3413_s5] ss:$0 sm:$0xff]  ;;  %s3424_s5 = smov 104  }
 0x367   : > { %v985_v31 = vpop.permute.xlu0 %984 }
 0x368   : > { %v990_v32 = vsel %vm872_vm6, %v985_v31, 0  ;;  %v2572_v31 = vld [vmem:[%s3415_s9] ss:$0 sm:$0xff] }
 0x369   : > { %999 = vmatpush.bf16.msrb.mxu1 %v990_v32 }
 0x36d   : > { %1180 = vmatpush.bf16.msra.mxu1 %v2469_v17  ;;  %v2575_v17 = vld [vmem:[%s3332_s14] ss:$0 sm:$0xff] }
 0x3ae   : > { %v863_v33 = vpop.xlane.xlu1 %862 }
 0x3af   : > { %2600 = vrcp.f32 %v863_v33 }
 0x3b5   : > { %v2601_v34 = vpop.eup %2600 }
 0x3b6   : > { %v865_v35 = vmul.f32 %v2601_v34, %v2593_v9 }
 0x3b8   : > { %v866_v37 = vpack.c.bf16 %v865_v35, %v865_v35 }
 0x3ba   : > { %2223 = vmatmul.msk.bf16.vlgmr.msra.gmra.mxu2 %vm830_vm5, %v866_v37  ;;  %v2475_v37 = vld [vmem:[%s3330_s12 + $0x28] sm:$0xff] }
 0x3bb   : > { %1057 = vmatpush.bf16.msra.mxu2 %v1048_v38  ;;  %1267 = vmatpush.bf16.msra.mxu3 %v2475_v37  ;;  %v2474_v38 = vld [vmem:[%s3330_s12 + $0x20] sm:$0xff] }
 0x3bc   : > { %v922_v39 = vpop.xlane.xlu1 %921 }
 0x3bd   : > { %2602 = vrcp.f32 %v922_v39  ;;  %v2473_v39 = vld [vmem:[%s3330_s12 + $0x18] sm:$0xff] }
 0x3bf   : > { %1268 = vmatpush.bf16.msra.mxu3 %v2474_v38 }
 0x3c3   : > { %v2603_v40 = vpop.eup %2602  ;;  %1269 = vmatpush.bf16.msra.mxu3 %v2473_v39 }
 0x3c4   : > { %v924_v41 = vmul.f32 %v2603_v40, %v2595_v15  ;;  %v2472_v40 = vld [vmem:[%s3330_s12 + $0x10] sm:$0xff] }
 0x3c6   : > { %v925_v42 = vpack.c.bf16 %v924_v41, %v924_v41  ;;  %v2471_v41 = vld [vmem:[%s3330_s12 + $0x8] sm:$0xff] }
 0x3c7   : > { %1270 = vmatpush.bf16.msra.mxu3 %v2472_v40 }
 0x3ca   : > { %2225 = vmatmul.msk.bf16.vlgmr.msrb.gmra.mxu2 %vm830_vm5, %v925_v42  ;;  %v2470_v42 = vld [vmem:[%s3330_s12] sm:$0xff] }
 0x3cb   : > { %1271 = vmatpush.bf16.msra.mxu3 %v2471_v41 }
 0x3cc   : > { %v1038_v43 = vpop.xlane.xlu1 %1037 }
 0x3cd   : > { %2604 = vrcp.f32 %v1038_v43  ;;  %v2573_v43 = vld [vmem:[%s3416_s11] ss:$0 sm:$0xff] }
 0x3cf   : > { %1272 = vmatpush.bf16.msra.mxu3 %v2470_v42 }
 0x3d3   : > { %v2605_v44 = vpop.eup %2604 }
 0x3d4   : > { %v1040_v45 = vmul.f32 %v2605_v44, %v2597_v24  ;;  %v980_v46 = vpop.xlane.xlu1 %979 }
 0x3d5   : > { %2606 = vrcp.f32 %v980_v46 }
 0x3d6   : > { %v1041_v47 = vpack.c.bf16 %v1040_v45, %v1040_v45 }
 0x3da   : > { %2229 = vmatmul.msk.bf16.vlgmr.msra.gmra.mxu2 %vm830_vm5, %v1041_v47 }
 0x3db   : > { %v2607_v49 = vpop.eup %2606 }
 0x3dc   : > { %v982_v50 = vmul.f32 %v2607_v49, %v2599_v26 }
 0x3de   : > { %v983_v51 = vpack.c.bf16 %v982_v50, %v982_v50 }
 0x3e0   : > { %2227 = vmatmul.msk.bf16.vlgmr.msrb.gmra.mxu1 %vm830_vm5, %v983_v51 }
 0x43d   : > { %v885_v52 = vpop.f32.mrf.mxu2 }
 0x445   : > { %v887_v53 = vpop.f32.mrf.mxu2 }
 0x44d   : > { %v943_v54 = vpop.f32.mrf.mxu2 }
 0x44e   : > { %1064 = vrot.lane.b32.xlu1 %v943_v54, %s3367_s4  ;;  %s3418_s4 = smov 96  }
 0x455   : > { %v945_v55 = vpop.f32.mrf.mxu2 }
 0x45d   : > { %v1001_v56 = vpop.f32.mrf.mxu1  ;;  %v1059_v57 = vpop.f32.mrf.mxu2 }
 0x45e   : > { %1072 = vrot.lane.b32.xlu0 %v1059_v57, %s3366_s25  ;;  %1068 = vrot.lane.b32.xlu2 %v1001_v56, %s3364_s1  ;;  %s3411_s1 = sld [smem:[#allocation19_spill]]  ;;  %s3417_s25 = smov 64  }
 0x464   : > { %v2570_v5 = vld [vmem:[%s3411_s1] ss:$0 sm:$0xff] }
 0x465   : > { %v1003_v58 = vpop.f32.mrf.mxu1  ;;  %v1061_v59 = vpop.f32.mrf.mxu2 }
 0x466   : > { %v2574_v58 = vld [vmem:[%s3331_s13] ss:$0 sm:$0xff] }
 0x4b8   : > { %v1069_v0 = vpop.permute.xlu2 %1068 }
 0x4c0   : > { %v1065_v62 = vpop.permute.xlu1 %1064 }
 0x4c1   : > { %v1075_v63 = vsel %vm830_vm5, %v885_v52, %v1065_v62 }
 0x4c2   : > { %v1077_v2 = vsel %vm1076_vm7, %v1075_v63, %v1069_v0 }
 0x4d0   : > { %v1073_v1 = vpop.permute.xlu0 %1072 }
 0x4d1   : > { %v1079_v3 = vsel %vm1078_vm8, %v1077_v2, %v1073_v1 }
 0x4d2   : > { %v1080_v4 = vpack.c.bf16 %v1079_v3, %v1079_v3 }
 0x4d4   : > { %2238 = vmatmul.msk.bf16.vlgmr.msra.gmra.mxu0 %vm750_vm0, %v1080_v4 }
 0x551   : > { %v1113_v6 = vpop.f32.mrf.mxu0 }
 0x552   : > { %v1114_v7 = vadd.f32 %v2570_v5, %v1113_v6  ;;  %v2479_v5 = vld [vmem:[%s3404_s30 + $0x18] sm:$0xff]  ;;  %v2478_v6 = vld [vmem:[%s3404_s30 + $0x10] sm:$0xff] }
 0x553   : > { %1343 = vmatpush.bf16.msrb.mxu2 %v2479_v5 }
 0x554   : > { %v1117_v9 = vadd.f32 %v1114_v7, %v2919_v30  ;;  %v2468_v30 = vld [vmem:[%s3412_s10] sm:$0xff] }
 0x555   : > { %1181 = vmatpush.bf16.msra.mxu1 %v2468_v30 }
 0x556   : > { %v1120_v10 = vsel %vm750_vm0, %v1117_v9, 0.0 }
 0x557   : > { %1121 = vadd.xlane.f32.xlu2 %v1120_v10  ;;  %1344 = vmatpush.bf16.msrb.mxu2 %v2478_v6 }
 0x559   : > { %v1115_v11 = vpop.f32.mrf.mxu0 }
 0x5ca   : > { %v1122_v12 = vpop.xlane.xlu2 %1121 }
 0x5cb   : > { %v1123_v13 = vmul.f32 %v1122_v12, %v2902_v8 }
 0x5cd   : > { %v1124_v14 = vsub.f32 %v1117_v9, %v1123_v13 }
 0x5cf   : > { %v1125_v15 = vmul.f32 %v1124_v14, %v1124_v14 }
 0x5d1   : > { %v1126_v16 = vsel %vm750_vm0, %v1125_v15, 0.0 }
 0x5d2   : > { %1127 = vadd.xlane.f32.xlu0 %v1126_v16 }
 0x645   : > { %v1128_v19 = vpop.xlane.xlu0 %1127 }
 0x646   : > { %v1129_v20 = vmul.f32 %v1128_v19, %v2902_v8 }
 0x648   : > { %v1130_v21 = vadd.f32 1e-12, %v1129_v20 }
 0x64a   : > { %2608 = vrsqrt.f32 %v1130_v21  ;;  %vm1137_vm10 = vweird.f32 %v1130_v21 }
 0x650   : > { %v2609_v22 = vpop.eup %2608 }
 0x651   : > { %v1132_v23 = vmul.f32 %v2609_v22, %v1130_v21  ;;  %vm1138_vm9 = vweird.f32 %v2609_v22 }
 0x652   : > { %vm1139_vm11 = vmor %vm1137_vm10, %vm1138_vm9  ;;  %vm1881_vm10 = vcmask 523264  }
 0x653   : > { %v1133_v24 = vmul.f32 %v2609_v22, %v1132_v23  ;;  %v2577_v23 = vld [vmem:[%s3408_s23 + $0x1] ss:$0 sm:$0xff] }
 0x655   : > { %v1134_v25 = vmul.f32 0.5, %v1133_v24 }
 0x657   : > { %v1135_v26 = vsub.f32 1.5, %v1134_v25 }
 0x659   : > { %v1136_v27 = vmul.f32 %v2609_v22, %v1135_v26 }
 0x65b   : > { %v1140_v29 = vsel %vm1139_vm11, %v2609_v22, %v1136_v27  ;;  %vm1965_vm11 = vcmask 785408  }
 0x65c   : > { %v1141_v32 = vmul.f32 %v1140_v29, %v1124_v14 }
 0x65e   : > { %v1145_v33 = vmul.f32 %v2571_v28, %v1141_v32 }
 0x660   : > { %v1149_v34 = vadd.f32 %v2572_v31, %v1145_v33 }
 0x662   : > { %v1150_v35 = vpack.c.bf16 %v1149_v34, %v1149_v34 }
 0x664   : > { %2247 = vmatmul.msk.bf16.vlgmr.msra.gmra.mxu1 %vm750_vm0, %v1150_v35 }
 0x6e1   : > { %v1183_v44 = vpop.f32.mrf.mxu1 }
 0x6e2   : > { %v1184_v45 = vadd.f32 %v2573_v43, %v1183_v44 }
 0x6e4   : > { %v1187_v46 = vmul.f32 %v1184_v45, %v1184_v45 }
 0x6e6   : > { %v1188_v47 = vmul.f32 %v1187_v46, %v1184_v45 }
 0x6e8   : > { %v1189_v49 = vmul.f32 0.044715, %v1188_v47 }
 0x6e9   : > { %v1185_v50 = vpop.f32.mrf.mxu1 }
 0x6ea   : > { %v1190_v51 = vadd.f32 %v1189_v49, %v1184_v45 }
 0x6ec   : > { %v1191_v52 = vmul.f32 0.7978846, %v1190_v51 }
 0x6ee   : > { %2610 = vtanh.f32 %v1191_v52 }
 0x6f4   : > { %v2611_v53 = vpop.eup %2610 }
 0x6f5   : > { %v1193_v54 = vadd.f32 1.0, %v2611_v53 }
 0x6f7   : > { %v1194_v55 = vmul.f32 0.5, %v1193_v54 }
 0x6f9   : > { %v1195_v56 = vmul.f32 %v1194_v55, %v1184_v45 }
 0x6fb   : > { %v1196_v57 = vpack.c.bf16 %v1195_v56, %v1195_v56 }
 0x6fd   : > { %1273 = vmatmul.bf16.vlgmr.msra.gmra.mxu3 %v1196_v57 }
 0x780   : > { %v1274_v59 = vpop.f32.mrf.mxu3 }
 0x781   : > { %v1275_v60 = vadd.f32 %v2574_v58, %v1274_v59 }
 0x783   : > { %v1278_v61 = vadd.f32 %v1275_v60, %v1149_v34 }
 0x785   : > { %v1281_v62 = vsel %vm750_vm0, %v1278_v61, 0.0 }
 0x786   : > { %1282 = vadd.xlane.f32.xlu1 %v1281_v62 }
 0x788   : > { %v1276_v63 = vpop.f32.mrf.mxu3 }
 0x7f9   : > { %v1283_v0 = vpop.xlane.xlu1 %1282 }
 0x7fa   : > { %v1284_v1 = vmul.f32 %v1283_v0, %v2902_v8 }
 0x7fc   : > { %v1285_v2 = vsub.f32 %v1278_v61, %v1284_v1 }
 0x7fe   : > { %v1286_v3 = vmul.f32 %v1285_v2, %v1285_v2 }
 0x800   : > { %v1287_v4 = vsel %vm750_vm0, %v1286_v3, 0.0 }
 0x801   : > { %1288 = vadd.xlane.f32.xlu2 %v1287_v4 }
 0x874   : > { %v1289_v7 = vpop.xlane.xlu2 %1288 }
 0x875   : > { %v1290_v9 = vmul.f32 %v1289_v7, %v2902_v8 }
 0x877   : > { %v1291_v10 = vadd.f32 1e-12, %v1290_v9 }
 0x879   : > { %2612 = vrsqrt.f32 %v1291_v10  ;;  %vm1298_vm13 = vweird.f32 %v1291_v10 }
 0x87f   : > { %v2613_v11 = vpop.eup %2612 }
 0x880   : > { %v1293_v12 = vmul.f32 %v2613_v11, %v1291_v10  ;;  %vm1299_vm12 = vweird.f32 %v2613_v11 }
 0x881   : > { %vm1300_vm14 = vmor %vm1298_vm13, %vm1299_vm12  ;;  %vm2079_vm12 = vcmask 61440   ;;  %vm1899_vm13 = vcmask 63488  }
 0x882   : > { %v1294_v13 = vmul.f32 %v2613_v11, %v1293_v12 }
 0x884   : > { %v1295_v14 = vmul.f32 0.5, %v1294_v13 }
 0x886   : > { %v1296_v15 = vsub.f32 1.5, %v1295_v14 }
 0x888   : > { %v1297_v16 = vmul.f32 %v2613_v11, %v1296_v15 }
 0x88a   : > { %v1301_v30 = vsel %vm1300_vm14, %v2613_v11, %v1297_v16 }
 0x88b   : > { %v1302_v19 = vmul.f32 %v1301_v30, %v1285_v2 }
 0x88d   : > { %v1306_v20 = vmul.f32 %v2575_v17, %v1302_v19 }
 0x88f   : > { %v3067_v21 = vadd.f32 %v2576_v18, %v1306_v20 }
 0x891   : > { %v1311_v22 = vpack.c.bf16 %v3067_v21, %v3067_v21 }
 0x893   : > { %2293 = vmatmul.msk.bf16.vlgmr.msrb.gmra.mxu2 %vm750_vm0, %v1311_v22 }
 0x916   : > { %v1346_v24 = vpop.f32.mrf.mxu2 }
 0x917   : > { %v1347_v25 = vadd.f32 %v2577_v23, %v1346_v24 }
 0x919   : > { %v3075_v26 = vpack.c.bf16 %v1347_v25, %v1347_v25 }
 0x91b   : > { %1387 = vrot.lane.b32.xlu1 %v3075_v26, %s3417_s25  ;;  %1352 = vrot.lane.b32.xlu0 %v3075_v26, %s3418_s4 }
 0x91e   : > { %v1348_v27 = vpop.f32.mrf.mxu2 }
 0x923   : > { %1408 = vrot.lane.b32.xlu0 %v3075_v26, %s3419_s27  ;;  %s3427_s27 = smov 48  }
 0x92b   : > { %1468 = vrot.lane.b32.xlu0 %v3075_v26, %s3420_s28  ;;  %s3428_s28 = smov 8  }
 0x933   : > { %1526 = vrot.lane.b32.xlu0 %v3075_v26, %s3421_s0  ;;  %s3429_s0 = smov 24  }
 0x98d   : > { %v1388_v28 = vpop.permute.xlu1 %1387  ;;  %v1353_v29 = vpop.permute.xlu0 %1352 }
 0x98e   : > { %v1393_v31 = vsel %vm872_vm6, %v1388_v28, 0  ;;  %v1358_v32 = vsel %vm830_vm5, %v1353_v29, 0 }
 0x98f   : > { %1367 = vmatpush.bf16.xpose.msrb.mxu0 %v1358_v32  ;;  %1402 = vmatpush.bf16.msrb.mxu1 %v1393_v31 }
 0x995   : > { %v1409_v33 = vpop.permute.xlu0 %1408 }
 0x996   : > { %2294 = vmatmul.msk.bf16.vlgmr.msrb.gmra.mxu0 %vm830_vm5, %v3075_v26 }
 0x99d   : > { %v1469_v34 = vpop.permute.xlu0 %1468 }
 0x99e   : > { %v1474_v35 = vsel %vm830_vm5, %v1469_v34, 0 }
 0x99f   : > { %1483 = vmatpush.bf16.xpose.msra.mxu1 %v1474_v35 }
 0x9a5   : > { %v1527_v44 = vpop.permute.xlu0 %1526 }
 0x9a6   : > { %v1532_v47 = vsel %vm830_vm5, %v1527_v44, 0 }
 0xa13   : > { %v1369_v36 = vpop.f32.mrf.mxu0 }
 0xa14   : > { %v1373_v37 = vmul.f32 0.35355338, %v1369_v36 }
 0xa16   : > { %v1374_v38 = vadd.f32 %v2957_v48, %v1373_v37 }
 0xa18   : > { %v1375_v39 = vsel %vm830_vm5, %v1374_v38, -inf }
 0xa19   : > { %1376 = vmax.xlane.f32.xlu2 %v1375_v39 }
 0xa1b   : > { %v1371_v40 = vpop.f32.mrf.mxu0 }
 0xa31   : > { %1410 = vrot.lane.b32.xlu2 %v3075_v26, %s3422_s2  ;;  %s3430_s2 = smov 16  }
 0xa39   : > { %1466 = vrot.lane.b32.xlu2 %v3075_v26, %s3423_s7 }
 0xa8c   : > { %v1377_v41 = vpop.xlane.xlu2 %1376 }
 0xa8d   : > { %v1378_v42 = vsub.f32 %v1374_v38, %v1377_v41 }
 0xa8f   : > { %v1379_v43 = vmul.f32 1.442695, %v1378_v42 }
 0xa91   : > { %2614 = vpow2.f32 %v1379_v43 }
 0xa94   : > { %v1411_v45 = vpop.permute.xlu2 %1410 }
 0xa95   : > { %v1416_v46 = vsel %vm830_vm5, %v1411_v45, 0 }
 0xa96   : > { %1425 = vmatpush.bf16.xpose.msra.mxu2 %v1416_v46 }
 0xa97   : > { %v2615_v49 = vpop.eup %2614 }
 0xa98   : > { %v1381_v50 = vsel %vm830_vm5, %v2615_v49, 0.0 }
 0xa99   : > { %1382 = vadd.xlane.f32.xlu1 %v1381_v50 }
 0xa9c   : > { %v1467_v60 = vpop.permute.xlu2 %1466 }
 0xa9d   : > { %2296 = vmatmul.msk.bf16.vlgmr.msra.gmra.mxu2 %vm830_vm5, %v1409_v33 }
 0xa9e   : > { %1541 = vmatpush.bf16.xpose.msrb.mxu2 %v1532_v47 }
 0xab2   : > { %1524 = vrot.lane.b32.xlu1 %v3075_v26, %s3424_s5 }
 0xb0c   : > { %v1383_v51 = vpop.xlane.xlu1 %1382 }
 0xb0d   : > { %2616 = vrcp.f32 %v1383_v51  ;;  %v2481_v51 = vld [vmem:[%s3410_s29 + $0x18] sm:$0xff] }
 0xb13   : > { %v2617_v52 = vpop.eup %2616 }
 0xb14   : > { %v1385_v53 = vmul.f32 %v2617_v52, %v2615_v49  ;;  %v2480_v52 = vld [vmem:[%s3410_s29 + $0x10] sm:$0xff] }
 0xb16   : > { %v1386_v54 = vpack.c.bf16 %v1385_v53, %v1385_v53 }
 0xb18   : > { %2295 = vmatmul.msk.bf16.vlgmr.msrb.gmra.mxu1 %vm830_vm5, %v1386_v54 }
 0xb19   : > { %1629 = vmatpush.bf16.msrb.mxu1 %v2481_v51 }
 0xb1d   : > { %1630 = vmatpush.bf16.msrb.mxu1 %v2480_v52 }
 0xb20   : > { %v1427_v55 = vpop.f32.mrf.mxu2 }
 0xb21   : > { %v1431_v56 = vmul.f32 0.35355338, %v1427_v55 }
 0xb23   : > { %v1432_v57 = vadd.f32 %v2957_v48, %v1431_v56 }
 0xb24   : > { %v1525_v58 = vpop.permute.xlu1 %1524 }
 0xb25   : > { %2300 = vmatmul.msk.bf16.vlgmr.msrb.gmra.mxu2 %vm830_vm5, %v1525_v58  ;;  %v1433_v59 = vsel %vm830_vm5, %v1432_v57, -inf }
 0xb26   : > { %1434 = vmax.xlane.f32.xlu0 %v1433_v59 }
 0xb28   : > { %v1429_v61 = vpop.f32.mrf.mxu2  ;;  %2298 = vmatmul.msk.bf16.vlgmr.msra.gmra.mxu1 %vm830_vm5, %v1467_v60  ;;  %v2578_v60 = vld [vmem:[%s3411_s1 + $0x1] ss:$0 sm:$0xff] }
 0xb95   : > { %v3109_v62 = vpop.f32.mrf.mxu1 }
 0xb99   : > { %v1435_v63 = vpop.xlane.xlu0 %1434 }
 0xb9a   : > { %v1436_v0 = vsub.f32 %v1432_v57, %v1435_v63 }
 0xb9c   : > { %v1437_v1 = vmul.f32 1.442695, %v1436_v0 }
 0xb9d   : > { %v1406_v2 = vpop.f32.mrf.mxu1 }
 0xb9e   : > { %2618 = vpow2.f32 %v1437_v1 }
 0xba4   : > { %v2619_v3 = vpop.eup %2618 }
 0xba5   : > { %v1485_v4 = vpop.f32.mrf.mxu1  ;;  %v1439_v5 = vsel %vm830_vm5, %v2619_v3, 0.0 }
 0xba6   : > { %v1489_v6 = vmul.f32 0.35355338, %v1485_v4  ;;  %1440 = vadd.xlane.f32.xlu0 %v1439_v5 }
 0xba8   : > { %v1543_v7 = vpop.f32.mrf.mxu2  ;;  %v1490_v9 = vadd.f32 %v2957_v48, %v1489_v6 }
 0xba9   : > { %v1547_v10 = vmul.f32 0.35355338, %v1543_v7  ;;  %v2483_v7 = vld [vmem:[%s3412_s10 + $0x18] sm:$0xff] }
 0xbaa   : > { %v1491_v11 = vsel %vm830_vm5, %v1490_v9, -inf }
 0xbab   : > { %1492 = vmax.xlane.f32.xlu2 %v1491_v11  ;;  %v1548_v12 = vadd.f32 %v2957_v48, %v1547_v10 }
 0xbad   : > { %v1487_v13 = vpop.f32.mrf.mxu1  ;;  %v1549_v14 = vsel %vm830_vm5, %v1548_v12, -inf }
 0xbae   : > { %1550 = vmax.xlane.f32.xlu1 %v1549_v14 }
 0xbb0   : > { %v1545_v15 = vpop.f32.mrf.mxu2 }
 0xbc3   : > { %1445 = vrot.lane.b32.xlu2 %v3075_v26, %s3425_s24 }
 0xc19   : > { %v1441_v16 = vpop.xlane.xlu0 %1440 }
 0xc1a   : > { %2620 = vrcp.f32 %v1441_v16 }
 0xc1e   : > { %v1493_v17 = vpop.xlane.xlu2 %1492 }
 0xc1f   : > { %v1494_v30 = vsub.f32 %v1490_v9, %v1493_v17  ;;  %v2491_v9 = vld [vmem:[%s3330_s12 + $0x78] sm:$0xff] }
 0xc20   : > { %v2621_v20 = vpop.eup %2620  ;;  %1790 = vmatpush.bf16.msra.mxu2 %v2491_v9 }
 0xc21   : > { %v1495_v18 = vmul.f32 1.442695, %v1494_v30  ;;  %v1551_v19 = vpop.xlane.xlu1 %1550  ;;  %v1443_v24 = vmul.f32 %v2621_v20, %v2619_v3  ;;  %v2580_v20 = vld [vmem:[%s3415_s9 + $0x1] ss:$0 sm:$0xff] }
 0xc22   : > { %v1552_v22 = vsub.f32 %v1548_v12, %v1551_v19 }
 0xc23   : > { %2622 = vpow2.f32 %v1495_v18  ;;  %v1444_v28 = vpack.c.bf16 %v1443_v24, %v1443_v24  ;;  %v2579_v18 = vld [vmem:[%s3414_s8 + $0x1] ss:$0 sm:$0xff]  ;;  %s3431_s8 = sld [smem:[#allocation25_spill]] }
 0xc24   : > { %v1553_v23 = vmul.f32 1.442695, %v1552_v22 }
 0xc26   : > { %2624 = vpow2.f32 %v1553_v23  ;;  %v1446_v48 = vpop.permute.xlu2 %1445 }
 0xc27   : > { %v1451_v25 = vsel %vm872_vm6, %v1446_v48, 0 }
 0xc28   : > { %1460 = vmatpush.bf16.msra.mxu0 %v1451_v25  ;;  %v2490_v25 = vld [vmem:[%s3330_s12 + $0x70] sm:$0xff] }
 0xc29   : > { %v2623_v27 = vpop.eup %2622  ;;  %1791 = vmatpush.bf16.msra.mxu2 %v2490_v25  ;;  %v2497_v25 = vld [vmem:[%s3335_s17 + $0x8] sm:$0xff]  ;;  %s2140_s9 = scalar_lea.hbm %s3431_s8, %s2862_s6  ;;  %s2656_s7 = scalar_lea.hbm %s3431_s8, 2 }
 0xc2a   : > { %v1497_v29 = vsel %vm830_vm5, %v2623_v27, 0.0 }
 0xc2b   : > { %1498 = vadd.xlane.f32.xlu1 %v1497_v29  ;;  %2297 = vmatmul.msk.bf16.vlgmr.msra.gmra.mxu0 %vm830_vm5, %v1444_v28  ;;  %v2488_v28 = vld [vmem:[%s3330_s12 + $0x60] sm:$0xff]  ;;  %v2487_v29 = vld [vmem:[%s3330_s12 + $0x58] sm:$0xff] }
 0xc2c   : > { %v2625_v31 = vpop.eup %2624 }
 0xc2d   : > { %v1555_v32 = vsel %vm830_vm5, %v2625_v31, 0.0 }
 0xc2e   : > { %1556 = vadd.xlane.f32.xlu0 %v1555_v32  ;;  %v2485_v32 = vld [vmem:[%s3330_s12 + $0x48] sm:$0xff] }
 0xc42   : > { %1561 = vrot.lane.b32.xlu0 %v3075_v26, %s3426_s3 }
 0xc44   : > { %1503 = vrot.lane.b32.xlu1 %v3075_v26, %s3427_s27  ;;  %s2715_s27 = smov 32  }
 0xc9e   : > { %v1499_v35 = vpop.xlane.xlu1 %1498 }
 0xca1   : > { %v1557_v33 = vpop.xlane.xlu0 %1556 }
 0xca2   : > { %2626 = vrcp.f32 %v1557_v33  ;;  %v2484_v33 = vld [vmem:[%s3330_s12 + $0x40] sm:$0xff] }
 0xca3   : > { %2628 = vrcp.f32 %v1499_v35 }
 0xca8   : > { %v1462_v34 = vpop.f32.mrf.mxu0  ;;  %v2627_v36 = vpop.eup %2626 }
 0xca9   : > { %1583 = vrot.lane.b32.xlu2 %v1462_v34, %s3428_s28  ;;  %v2629_v38 = vpop.eup %2628  ;;  %v1559_v39 = vmul.f32 %v2627_v36, %v2625_v31  ;;  %v2486_v31 = vld [vmem:[%s3330_s12 + $0x50] sm:$0xff]  ;;  %v2581_v34 = vld [vmem:[%s3416_s11 + $0x1] ss:$0 sm:$0xff] }
 0xcaa   : > { %v1501_v41 = vmul.f32 %v2629_v38, %v2623_v27  ;;  %v2489_v27 = vld [vmem:[%s3330_s12 + $0x68] sm:$0xff] }
 0xcab   : > { %v1560_v44 = vpack.c.bf16 %v1559_v39, %v1559_v39  ;;  %1792 = vmatpush.bf16.msra.mxu2 %v2489_v27  ;;  %v2503_v27 = vld [vmem:[%s3336_s18 + $0x8] sm:$0xff] }
 0xcac   : > { %v1502_v45 = vpack.c.bf16 %v1501_v41, %v1501_v41 }
 0xcaf   : > { %1793 = vmatpush.bf16.msra.mxu2 %v2488_v28  ;;  %v2496_v28 = vld [vmem:[%s3335_s17] sm:$0xff] }
 0xcb0   : > { %v1464_v37 = vpop.f32.mrf.mxu0 }
 0xcb3   : > { %1794 = vmatpush.bf16.msra.mxu2 %v2487_v29  ;;  %v2502_v29 = vld [vmem:[%s3336_s18] sm:$0xff] }
 0xcb4   : > { %v1562_v40 = vpop.permute.xlu0 %1561 }
 0xcb5   : > { %v1567_v42 = vsel %vm872_vm6, %v1562_v40, 0 }
 0xcb6   : > { %v1504_v43 = vpop.permute.xlu1 %1503  ;;  %1576 = vmatpush.bf16.msrb.mxu0 %v1567_v42 }
 0xcb7   : > { %v1509_v26 = vsel %vm872_vm6, %v1504_v43, 0  ;;  %1795 = vmatpush.bf16.msra.mxu2 %v2486_v31 }
 0xcb8   : > { %1518 = vmatpush.bf16.msrb.mxu3 %v1509_v26 }
 0xcb9   : > { %2301 = vmatmul.msk.bf16.vlgmr.msrb.gmra.mxu0 %vm830_vm5, %v1560_v44 }
 0xcbb   : > { %2299 = vmatmul.msk.bf16.vlgmr.msrb.gmra.mxu3 %vm830_vm5, %v1502_v45  ;;  %1796 = vmatpush.bf16.msra.mxu2 %v2485_v32 }
 0xcbc   : > { %1703 = vmatpush.bf16.msra.mxu3 %v2483_v7  ;;  %v2583_v7 = vld [vmem:[%s3332_s14 + $0x1] ss:$0 sm:$0xff] }
 0xcbf   : > { %1797 = vmatpush.bf16.msra.mxu2 %v2484_v33 }
 0xd03   : > { %v1584_v53 = vpop.permute.xlu2 %1583 }
 0xd04   : > { %v1594_v55 = vsel %vm830_vm5, %v3109_v62, %v1584_v53 }
 0xd36   : > { %v1578_v46 = vpop.f32.mrf.mxu0 }
 0xd37   : > { %1591 = vrot.lane.b32.xlu0 %v1578_v46, %s3429_s0 }
 0xd3e   : > { %v1520_v47 = vpop.f32.mrf.mxu3  ;;  %v1580_v49 = vpop.f32.mrf.mxu0 }
 0xd3f   : > { %1587 = vrot.lane.b32.xlu2 %v1520_v47, %s3430_s2  ;;  %v2582_v47 = vld [vmem:[%s3331_s13 + $0x1] ss:$0 sm:$0xff] }
 0xd46   : > { %v1522_v50 = vpop.f32.mrf.mxu3 }
 0xd99   : > { %v1588_v54 = vpop.permute.xlu2 %1587 }
 0xd9a   : > { %v1595_v56 = vsel %vm1076_vm7, %v1594_v55, %v1588_v54 }
 0xda9   : > { %v1592_v57 = vpop.permute.xlu0 %1591 }
 0xdaa   : > { %v1596_v58 = vsel %vm1078_vm8, %v1595_v56, %v1592_v57 }
 0xdab   : > { %v1597_v59 = vpack.c.bf16 %v1596_v58, %v1596_v58 }
 0xdad   : > { %2315 = vmatmul.msk.bf16.vlgmr.msrb.gmra.mxu1 %vm750_vm0, %v1597_v59 }
 0xe2a   : > { %v1632_v61 = vpop.f32.mrf.mxu1 }
 0xe2b   : > { %v1633_v63 = vadd.f32 %v2578_v60, %v1632_v61  ;;  %v2495_v60 = vld [vmem:[%s3334_s16 + $0x18] sm:$0xff] }
 0xe2c   : > { %1889 = vmatpush.bf16.msra.mxu0 %v2495_v60 }
 0xe2d   : > { %v1636_v0 = vadd.f32 %v1633_v63, %v3067_v21  ;;  %v2482_v21 = vld [vmem:[%s3412_s10 + $0x10] sm:$0xff]  ;;  %v2509_v63 = vld [vmem:[%s3336_s18 + $0x38] sm:$0xff] }
 0xe2e   : > { %1704 = vmatpush.bf16.msra.mxu3 %v2482_v21 }
 0xe2f   : > { %v1641_v1 = vsel %vm750_vm0, %v1636_v0, 0.0 }
 0xe30   : > { %1642 = vadd.xlane.f32.xlu1 %v1641_v1 }
 0xe32   : > { %v1634_v62 = vpop.f32.mrf.mxu1  ;;  %2065 = vmatpush.bf16.msrb.mxu3 %v2509_v63 }
 0xe33   : > { %v2493_v62 = vld [vmem:[%s3334_s16 + $0x8] sm:$0xff] }
 0xea3   : > { %v1643_v2 = vpop.xlane.xlu1 %1642 }
 0xea4   : > { %v1644_v3 = vmul.f32 %v1643_v2, %v2902_v8 }
 0xea6   : > { %v1645_v4 = vsub.f32 %v1636_v0, %v1644_v3  ;;  %v2494_v0 = vld [vmem:[%s3334_s16 + $0x10] sm:$0xff] }
 0xea7   : > { %1890 = vmatpush.bf16.msra.mxu0 %v2494_v0 }
 0xea8   : > { %v1646_v5 = vmul.f32 %v1645_v4, %v1645_v4 }
 0xeaa   : > { %v1647_v6 = vsel %vm750_vm0, %v1646_v5, 0.0 }
 0xeab   : > { %1648 = vadd.xlane.f32.xlu2 %v1647_v6  ;;  %1891 = vmatpush.bf16.msra.mxu0 %v2493_v62 }
 0xf1e   : > { %v1649_v10 = vpop.xlane.xlu2 %1648 }
 0xf1f   : > { %v1650_v11 = vmul.f32 %v1649_v10, %v2902_v8  ;;  %v2584_v10 = vld [vmem:[%s3333_s15 + $0x1] ss:$0 sm:$0xff] }
 0xf21   : > { %v1651_v12 = vadd.f32 1e-12, %v1650_v11 }
 0xf23   : > { %2630 = vrsqrt.f32 %v1651_v12  ;;  %vm1658_vm1 = vweird.f32 %v1651_v12 }
 0xf29   : > { %v2631_v13 = vpop.eup %2630 }
 0xf2a   : > { %v1653_v14 = vmul.f32 %v2631_v13, %v1651_v12  ;;  %vm1659_vm15 = vweird.f32 %v2631_v13 }
 0xf2b   : > { %vm1660_vm2 = vmor %vm1658_vm1, %vm1659_vm15 }
 0xf2c   : > { %v1654_v15 = vmul.f32 %v2631_v13, %v1653_v14 }
 0xf2e   : > { %v1655_v16 = vmul.f32 0.5, %v1654_v15 }
 0xf30   : > { %v1656_v17 = vsub.f32 1.5, %v1655_v16  ;;  %v2492_v16 = vld [vmem:[%s3334_s16] sm:$0xff] }
 0xf31   : > { %1892 = vmatpush.bf16.msra.mxu0 %v2492_v16 }
 0xf32   : > { %v1657_v30 = vmul.f32 %v2631_v13, %v1656_v17  ;;  %v2508_v17 = vld [vmem:[%s3336_s18 + $0x30] sm:$0xff] }
 0xf33   : > { %2066 = vmatpush.bf16.msrb.mxu3 %v2508_v17 }
 0xf34   : > { %v1661_v19 = vsel %vm1660_vm2, %v2631_v13, %v1657_v30  ;;  %v2501_v30 = vld [vmem:[%s3335_s17 + $0x28] sm:$0xff] }
 0xf35   : > { %v1662_v22 = vmul.f32 %v1661_v19, %v1645_v4  ;;  %1971 = vmatpush.bf16.msra.mxu1 %v2501_v30  ;;  %v2500_v19 = vld [vmem:[%s3335_s17 + $0x20] sm:$0xff] }
 0xf37   : > { %v1666_v23 = vmul.f32 %v2579_v18, %v1662_v22  ;;  %v2507_v18 = vld [vmem:[%s3336_s18 + $0x28] sm:$0xff]  ;;  %v2499_v22 = vld [vmem:[%s3335_s17 + $0x18] sm:$0xff] }
 0xf38   : > { %2067 = vmatpush.bf16.msrb.mxu3 %v2507_v18 }
 0xf39   : > { %v1670_v24 = vadd.f32 %v2580_v20, %v1666_v23  ;;  %v2506_v20 = vld [vmem:[%s3336_s18 + $0x20] sm:$0xff]  ;;  %1972 = vmatpush.bf16.msra.mxu1 %v2500_v19  ;;  %v2505_v23 = vld [vmem:[%s3336_s18 + $0x18] sm:$0xff] }
 0xf3b   : > { %v1671_v48 = vpack.c.bf16 %v1670_v24, %v1670_v24 }
 0xf3c   : > { %2068 = vmatpush.bf16.msrb.mxu3 %v2506_v20 }
 0xf3d   : > { %2331 = vmatmul.msk.bf16.vlgmr.msra.gmra.mxu3 %vm750_vm0, %v1671_v48  ;;  %1973 = vmatpush.bf16.msra.mxu1 %v2499_v22  ;;  %v2504_v48 = vld [vmem:[%s3336_s18 + $0x10] sm:$0xff] }
 0xf40   : > { %2069 = vmatpush.bf16.msrb.mxu3 %v2505_v23 }
 0xf44   : > { %2070 = vmatpush.bf16.msrb.mxu3 %v2504_v48 }
 0xf48   : > { %2071 = vmatpush.bf16.msrb.mxu3 %v2503_v27 }
 0xf4c   : > { %2072 = vmatpush.bf16.msrb.mxu3 %v2502_v29 }
 0xfc0   : > { %v1706_v35 = vpop.f32.mrf.mxu3 }
 0xfc1   : > { %v1707_v36 = vadd.f32 %v2581_v34, %v1706_v35 }
 0xfc3   : > { %v1710_v37 = vmul.f32 %v1707_v36, %v1707_v36 }
 0xfc5   : > { %v1711_v38 = vmul.f32 %v1710_v37, %v1707_v36 }
 0xfc7   : > { %v1712_v39 = vmul.f32 0.044715, %v1711_v38 }
 0xfc8   : > { %v1708_v40 = vpop.f32.mrf.mxu3 }
 0xfc9   : > { %v1713_v41 = vadd.f32 %v1712_v39, %v1707_v36 }
 0xfcb   : > { %v1714_v42 = vmul.f32 0.7978846, %v1713_v41 }
 0xfcd   : > { %2632 = vtanh.f32 %v1714_v42  ;;  %v2586_v42 = vld [vmem:[%s3338_s20] ss:$0 sm:$0xff] }
 0xfd3   : > { %v2633_v43 = vpop.eup %2632 }
 0xfd4   : > { %v1716_v44 = vadd.f32 1.0, %v2633_v43 }
 0xfd6   : > { %v1717_v26 = vmul.f32 0.5, %v1716_v44 }
 0xfd8   : > { %v1718_v45 = vmul.f32 %v1717_v26, %v1707_v36 }
 0xfda   : > { %v1719_v46 = vpack.c.bf16 %v1718_v45, %v1718_v45  ;;  %v2587_v45 = vld [vmem:[%s3339_s21] ss:$0 sm:$0xff] }
 0xfdc   : > { %1798 = vmatmul.bf16.vlgmr.msra.gmra.mxu2 %v1719_v46 }
0x105f   : > { %v1799_v49 = vpop.f32.mrf.mxu2 }
0x1060   : > { %v1800_v50 = vadd.f32 %v2582_v47, %v1799_v49 }
0x1062   : > { %v1803_v51 = vadd.f32 %v1800_v50, %v1670_v24  ;;  %v2498_v24 = vld [vmem:[%s3335_s17 + $0x10] sm:$0xff] }
0x1063   : > { %1974 = vmatpush.bf16.msra.mxu1 %v2498_v24 }
0x1064   : > { %v1808_v52 = vsel %vm750_vm0, %v1803_v51, 0.0 }
0x1065   : > { %1809 = vadd.xlane.f32.xlu0 %v1808_v52 }
0x1067   : > { %v1801_v53 = vpop.f32.mrf.mxu2  ;;  %1975 = vmatpush.bf16.msra.mxu1 %v2497_v25 }
0x106b   : > { %1976 = vmatpush.bf16.msra.mxu1 %v2496_v28 }
0x10d8   : > { %v1810_v54 = vpop.xlane.xlu0 %1809 }
0x10d9   : > { %v1811_v55 = vmul.f32 %v1810_v54, %v2902_v8 }
0x10db   : > { %v1812_v56 = vsub.f32 %v1803_v51, %v1811_v55 }
0x10dd   : > { %v1813_v57 = vmul.f32 %v1812_v56, %v1812_v56 }
0x10df   : > { %v1814_v58 = vsel %vm750_vm0, %v1813_v57, 0.0 }
0x10e0   : > { %1815 = vadd.xlane.f32.xlu1 %v1814_v58 }
0x1153   : > { %v1816_v59 = vpop.xlane.xlu1 %1815 }
0x1154   : > { %v1817_v61 = vmul.f32 %v1816_v59, %v2902_v8 }
0x1156   : > { %v1818_v1 = vadd.f32 1e-12, %v1817_v61 }
0x1158   : > { %2634 = vrsqrt.f32 %v1818_v1  ;;  %vm1825_vm4 = vweird.f32 %v1818_v1 }
0x115e   : > { %v2635_v2 = vpop.eup %2634 }
0x115f   : > { %v1820_v8 = vmul.f32 %v2635_v2, %v1818_v1  ;;  %vm1826_vm3 = vweird.f32 %v2635_v2 }
0x1160   : > { %vm1827_vm9 = vmor %vm1825_vm4, %vm1826_vm3 }
0x1161   : > { %v1821_v3 = vmul.f32 %v2635_v2, %v1820_v8 }
0x1163   : > { %v1822_v4 = vmul.f32 0.5, %v1821_v3 }
0x1165   : > { %v1823_v5 = vsub.f32 1.5, %v1822_v4 }
0x1167   : > { %v1824_v6 = vmul.f32 %v2635_v2, %v1823_v5  ;;  %v2585_v5 = vld [vmem:[%s3337_s19] ss:$0 sm:$0xff] }
0x1169   : > { %v1828_v21 = vsel %vm1827_vm9, %v2635_v2, %v1824_v6  ;;  %v2100_v2 = vld [vmem:[%s3340_s22 + $0x8] sm:$0xf] }
0x116a   : > { %v1829_v9 = vmul.f32 %v1828_v21, %v1812_v56  ;;  %v2107_v8 = vunpack.c.l.b16 %v2100_v2 }
0x116c   : > { %v1833_v11 = vmul.f32 %v2583_v7, %v1829_v9  ;;  %v2109_v3 = vpack.c.b16 %v2107_v8, %v2107_v8  ;;  %v2510_v7 = vld [vmem:[%s3340_s22] sm:$0xff] }
0x116e   : > { %v1837_v12 = vadd.f32 %v2584_v10, %v1833_v11  ;;  %v2115_v4 = vsel %vm872_vm6, %v2109_v3, 0 }
0x116f   : > { %2123 = vmatpush.bf16.msrb.mxu0 %v2115_v4 }
0x1170   : > { %v1991_v13 = vrot.slane %v1837_v12, 3  ;;  %v1907_v14 = vrot.slane %v1837_v12, 2  ;;  %v1839_v15 = vrot.slane %v1837_v12, 1 }
0x1172   : > { %1992 = vrot.lane.b32.xlu1 %v1991_v13, %s3418_s4  ;;  %1908 = vrot.lane.b32.xlu0 %v1907_v14, %s3417_s25  ;;  %s3433_s25 = sld [smem:[#allocation24_spill]] }
0x1173   : > { %1840 = vrot.lane.b32.xlu2 %v1839_v15, %s2715_s27  ;;  %2124 = vmatpush.bf16.msrb.mxu0 %v2510_v7  ;;  %s2144_s27 = sshll.u32 %s2140_s9, 4  ;;  %s2145_s27 = int_to_ptr.hbm [resolvable:$true] %s2144_s27 }
0x1174   : > { %s2650_s0 = sshra.s32 %s2145_s27, 4  ;;  %s2651_s0 = int_to_ptr.hbm [resolvable:$true] %s2650_s0 }
0x1175   : > { %s2652_s11 = scalar_lea.hbm %s2651_s0, 1  ;;  %p2657_p0 = scmp.lt.s32.totalorder %s2651_s0, %s3431_s8 }
0x1176   : > { %p2653_p11 = scmp.ne.s32.totalorder %s2651_s0, %s2652_s11  ;;  %p2658_p1 = scmp.lt.s32.totalorder %s2656_s7, %s2652_s11 }
0x1178   : > { %v2101_v20 = vld [vmem:[%s3433_s25] sm:$0x1]  ;;  %p2654_p12 = pnand %p2653_p11, %p2879_p5  ;;  %p2659_p2 = por %p2658_p1, %p2657_p0 }
0x117a   : > { %p2655_p13 = pneg %p2654_p12 }
0x117c   : > { %p2660_p3 = pnand %p2659_p2, %p2655_p13 }
0x11cd   : > { %v1841_v31 = vpop.permute.xlu2 %1840 }
0x11ce   : > { %v1843_v32 = vsel %vm750_vm0, %v1837_v12, %v1841_v31  ;;  %vm1983_vm0 = vcmask 62464  }
0x11cf   : > { %v1844_v33 = vpack.c.bf16 %v1843_v32, %v1843_v32 }
0x11d1   : > { %2399 = vmatmul.msk.bf16.vlgmr.msra.gmra.mxu0 %vm1881_vm10, %v1844_v33 }
0x11e4   : > { %v1993_v34 = vpop.permute.xlu1 %1992  ;;  %v1909_v35 = vpop.permute.xlu0 %1908 }
0x11e5   : > { %v1911_v36 = vsel %vm1881_vm10, %v1843_v32, %v1909_v35 }
0x11e6   : > { %v1912_v37 = vpack.c.bf16 %v1911_v36, %v1911_v36  ;;  %v1995_v38 = vsel %vm1965_vm11, %v1911_v36, %v1993_v34 }
0x11e7   : > { %v1996_v39 = vpack.c.bf16 %v1995_v38, %v1995_v38 }
0x11e8   : > { %2424 = vmatmul.msk.bf16.vlgmr.msra.gmra.mxu1 %vm1965_vm11, %v1912_v37 }
0x11e9   : > { %2073 = vmatmul.bf16.vlgmr.msrb.gmra.mxu3 %v1996_v39 }
0x124e   : > { %v1894_v40 = vpop.f32.mrf.mxu0 }
0x124f   : > { %v1895_v6 = vadd.f32 %v2585_v5, %v1894_v40 }
0x1251   : > { %v1898_v21 = vmax.f32 %v1895_v6, 0.0 }
0x1253   : > { %v1900_v9 = vsel %vm1899_vm13, %v1898_v21, -inf }
0x1254   : > { %v1901_v10 = vrot.slane %v1900_v9, 4 }
0x1256   : > { %v1896_v41 = vpop.f32.mrf.mxu0  ;;  %v1902_v11 = vmax.f32 %v1900_v9, %v1901_v10 }
0x1258   : > { %v1903_v12 = vrot.slane %v1902_v11, 2 }
0x125a   : > { %v1904_v13 = vmax.f32 %v1902_v11, %v1903_v12 }
0x125c   : > { %v1905_v14 = vrot.slane %v1904_v13, 1 }
0x125e   : > { %v1906_v15 = vmax.f32 %v1904_v13, %v1905_v14 }
0x1265   : > { %v1978_v43 = vpop.f32.mrf.mxu1 }
0x1266   : > { %v1979_v44 = vadd.f32 %v2586_v42, %v1978_v43 }
0x1268   : > { %v1982_v26 = vmax.f32 %v1979_v44, 0.0 }
0x126a   : > { %v1984_v46 = vsel %vm1983_vm0, %v1982_v26, -inf }
0x126b   : > { %v1985_v47 = vrot.slane %v1984_v46, 4 }
0x126c   : > { %v2074_v49 = vpop.f32.mrf.mxu3 }
0x126d   : > { %v1986_v50 = vmax.f32 %v1984_v46, %v1985_v47  ;;  %v2075_v51 = vadd.f32 %v2587_v45, %v2074_v49  ;;  %v1980_v52 = vpop.f32.mrf.mxu1 }
0x126f   : > { %v1987_v53 = vrot.slane %v1986_v50, 2  ;;  %v2078_v54 = vmax.f32 %v2075_v51, 0.0 }
0x1271   : > { %v2080_v55 = vsel %vm2079_vm12, %v2078_v54, -inf  ;;  %v1988_v56 = vmax.f32 %v1986_v50, %v1987_v53 }
0x1272   : > { %v2081_v57 = vrot.slane %v2080_v55, 4 }
0x1273   : > { %v1989_v58 = vrot.slane %v1988_v56, 1 }
0x1274   : > { %v2082_v59 = vmax.f32 %v2080_v55, %v2081_v57  ;;  %v2076_v60 = vpop.f32.mrf.mxu3 }
0x1275   : > { %v1990_v61 = vmax.f32 %v1988_v56, %v1989_v58 }
0x1276   : > { %v2083_v63 = vrot.slane %v2082_v59, 2 }
0x1277   : > { %2088 = vrot.lane.b32.xlu0 %v1990_v61, %s3428_s28 }
0x1278   : > { %v2084_v0 = vmax.f32 %v2082_v59, %v2083_v63 }
0x127a   : > { %v2085_v1 = vrot.slane %v2084_v0, 1 }
0x127c   : > { %v2086_v62 = vmax.f32 %v2084_v0, %v2085_v1 }
0x127e   : > { %2092 = vrot.lane.b32.xlu2 %v2086_v62, %s3430_s2  ;;  %s737_s2 = sand.u32 1, %s2690_s26  }
0x127f   : > { %s738_s24 = scalar_lea.vmem [#allocation2], %s737_s2  ;;  %s2132_s28 = scalar_lea.sflag [#allocation3], %s737_s2 }
0x1280   : > { %s2142_s3 = sshll.u32 %s738_s24, 4  ;;  %s2143_s3 = int_to_ptr.vmem [resolvable:$true] %s2142_s3 }
0x12d8   : > { %v2093_v17 = vpop.permute.xlu2 %2092 }
0x12e9   : > { %v2089_v16 = vpop.permute.xlu0 %2088 }
0x12ea   : > { %v2095_v30 = vsel %vm830_vm5, %v1906_v15, %v2089_v16 }
0x12eb   : > { %v2096_v18 = vsel %vm1076_vm7, %v2095_v30, %v2093_v17 }
0x12ec   : > { %v2097_v19 = vpack.c.bf16 %v2096_v18, %v2096_v18 }
0x12ee   : > { %2461 = vmatmul.msk.bf16.vlgmr.msrb.gmra.mxu0 %vm1078_vm8, %v2097_v19 }
0x136b   : > { %v2126_v22 = vpop.f32.mrf.mxu0 }
0x136c   : > { %v2127_v23 = vadd.f32 %v2126_v22, %v2101_v20 }
0x136e   : > { %2130 = vst [vmem:[%s738_s24] sm:$0x1] %v2127_v23 }
0x136f   : > { %2663 = shalt.err (!%p2660_p3)
}
0x1370   : > { %2511 = dma.vmem_to_hbm [thread:$0]  (%p2879_p5), %s2143_s3, 16, %s2145_s27, %s2132_s28  }
0x1373   : > { %v2128_v24 = vpop.f32.mrf.mxu0 }
0x1374 PF: > { %s3434_s2 = sld [smem:[#allocation7_spill]] }
0x1375   : > { %s3435_s9 = sld [smem:[#allocation5_spill]] }
0x137a   : > { %p2517_p4 = scmp.ge.s32.totalorder %s3434_s2, 2 }
0x137b   : > { %s2156_s24 = sand.u32 1, %s3435_s9  }
0x137c   : > { %p2514_p7 = pnand %p2517_p4, %p2883_p6  ;;  %s2157_s6 = scalar_lea.sflag [#allocation3], %s2156_s24 }
0x137e   : > { %p2515_p8 = pneg %p2514_p7 }
0x1380   : > { %2681 = dma.done.wait (%p2515_p8), %s2157_s6, 16  }
0x1381   : > { %2683 = vsyncadd (%p2515_p8), %s2157_s6, 4294967280  ;;  %s3437_s28 = sld [smem:[#allocation8_spill]]  ;;  %s3440_s5 = smov %s2690_s26 }
0x1382   : > { %s3438_s11 = sld [smem:[#allocation6_spill]] }
0x1383   : > { %s3439_s27 = sld [smem:[#allocation9_spill]] }
0x1387   : > { %p34_p9 = scmp.ge.s32.totalorder %s3437_s28, 4  }
0x1388   : > { %s3441_s26 = smov %s3438_s11 }
0x1389   :  { %36 = sbr.rel (!%p34_p9) target bundleno = 18 (0x12), region = 166 }
0x138e   :  { %2162 = vsyncpa [#allocation3], 1 }
0x138f   :  { %2164 = vsyncpa [#allocation3 + $0x1], 1 }

</bundles_post_ra>
